<compile_context>
chip_gen: v7x
topology: tpu7x:2x2x1
jax: 0.10.0
libtpu: 0.0.40
codegen_flags: <defaults>
</compile_context>

<pallas_src>
import math

import jax
import jax.numpy as jnp
import numpy as np
from jax import lax
from jax.experimental import pallas as pl
from jax.experimental.pallas import tpu as pltpu

LRELU_SLOPE = 0.2
BN_EPS = 1e-5
COMPUTE_DTYPE = jnp.bfloat16          # MXU operand + activation storage dtype
TM_MAX = 512                          # M tile (rows of the patch matrix)
TK_MAX = 2048                         # K (reduction) tile when K must be split
_W_RESIDENT_CAP = 16 * 1024 * 1024    # bytes (x2 buffers) allowed for resident W


def _vmem_limit_bytes():
    # v5e/v6e: 128 MiB physical -> ~96 MiB scoped; v7x: 64 MiB -> 48 MiB.
    try:
        phys = int(pltpu.get_tpu_info().vmem_capacity_bytes)
        if phys <= 0:
            raise ValueError(phys)
    except Exception:
        phys = 64 * 1024 * 1024       # conservative (v7x) fallback
    return min(phys * 3 // 4, 100 * 1024 * 1024)


_VMEM_LIMIT = _vmem_limit_bytes()
_TILE_BUDGET = _VMEM_LIMIT - 8 * 1024 * 1024   # headroom for Mosaic scratch


def _leaky(y):
    return jnp.where(y > 0.0, y, LRELU_SLOPE * y)


# ---------------------------------------------------------------------------
# Tile planning: no padding (tm | M, tk | K), VMEM-resident W when it fits.
# ---------------------------------------------------------------------------
def _fits(tm, tk, K, Cout, nk, w_resident):
    b = 2 * tm * tk * 2                              # patch tile, 2 bufs, bf16
    b += 2 * tm * Cout * 2                           # bf16 output tile, 2 bufs
    b += 2 * 2 * Cout * 4 * 2                        # partial-stat tiles (tiny)
    b += 2 * (K if w_resident else tk) * Cout * 2    # weights
    if nk > 1:
        b += tm * Cout * 4                           # f32 accumulator scratch
    return b <= _TILE_BUDGET


def _plan_tiles(M, K, Cout):
    """Pick (tm, tk, nk, w_resident) with tm | M, tk | K, all within budget."""
    if M % 8 == 0:
        tms = [d for d in range(8, min(M, TM_MAX) + 1, 8) if M % d == 0]
        tms.sort(reverse=True)
    else:                                            # unreachable for this net
        tms = [M]
    tks = [d for d in range(128, min(K, TK_MAX) + 1, 128) if K % d == 0]
    tks.sort(reverse=True)
    w_res_ok = 2 * K * Cout * 2 <= _W_RESIDENT_CAP

    for tm in tms:
        # Preferred: single-shot K, weights loaded once and kept resident.
        if _fits(tm, K, K, Cout, 1, True):
            return tm, K, 1, True
        # Fallback: K-tiled accumulation; keep W resident if it fits.
        for w_res in ((True, False) if w_res_ok else (False,)):
            for tk in tks:
                if _fits(tm, tk, K, Cout, K // tk, w_res):
                    return tm, tk, K // tk, w_res
    # Last resort (unrealistically large layer): smallest tiles.
    tm = tms[-1]
    if tks:
        return tm, tks[-1], K // tks[-1], False
    return tm, K, 1, True


# ---------------------------------------------------------------------------
# Pallas kernel factory: matmul (+ optional fused LeakyReLU or batch stats)
# ---------------------------------------------------------------------------
def _make_mm_kernel(*, tk, nk, want_stats, out_leaky, w_resident):
    def kernel(*refs):
        p_ref, w_ref, y_ref = refs[0], refs[1], refs[2]
        pos = 3
        if want_stats:
            sum_ref, sq_ref = refs[pos], refs[pos + 1]
            pos += 2
        acc_ref = refs[pos] if nk > 1 else None

        if nk > 1 and w_resident:
            k = pl.program_id(1)
            w = w_ref[pl.ds(pl.multiple_of(k * tk, tk), tk), :]
        else:
            w = w_ref[...]
        part = jnp.dot(p_ref[...], w, preferred_element_type=jnp.float32)

        def _finish(y):
            # bf16 store (next layer consumes bf16); stats from the f32 value.
            y_ref[...] = (_leaky(y) if out_leaky else y).astype(y_ref.dtype)
            if want_stats:
                sum_ref[0] = jnp.sum(y, axis=0, keepdims=True)
                sq_ref[0] = jnp.sum(y * y, axis=0, keepdims=True)

        if nk == 1:
            _finish(part)
        else:
            @pl.when(pl.program_id(1) == 0)
            def _():
                acc_ref[...] = jnp.zeros_like(acc_ref)

            acc_ref[...] += part

            @pl.when(pl.program_id(1) == nk - 1)
            def _():
                _finish(acc_ref[...])

    return kernel


# ---------------------------------------------------------------------------
# Per-layer wrapper: tiled matmul [+ partial batch stats] [+ fused LeakyReLU]
# ---------------------------------------------------------------------------
def conv_block_pallas(patches, w_mat, *, want_stats, out_leaky):
    """patches (M,K) bf16, w_mat (K,Cout) bf16 -> bf16 (M,Cout) [+ f32 stats]."""
    M, K = patches.shape
    Cout = w_mat.shape[1]
    tm, tk, nk, w_res = _plan_tiles(M, K, Cout)
    gm = M // tm
    w_block = (K, Cout) if (nk == 1 or w_res) else (tk, Cout)

    if nk == 1:
        grid = (gm,)
        semantics = ("parallel",)
        p_spec = pl.BlockSpec((tm, K), lambda i: (i, 0))
        w_spec = pl.BlockSpec(w_block, lambda i: (0, 0))        # resident W
        y_spec = pl.BlockSpec((tm, Cout), lambda i: (i, 0))
        st_spec = pl.BlockSpec((1, 1, Cout), lambda i: (i, 0, 0))
        scratch = []
    else:
        grid = (gm, nk)
        semantics = ("parallel", "arbitrary")
        p_spec = pl.BlockSpec((tm, tk), lambda i, k: (i, k))
        w_spec = pl.BlockSpec(
            w_block, (lambda i, k: (0, 0)) if w_res else (lambda i, k: (k, 0)))
        y_spec = pl.BlockSpec((tm, Cout), lambda i, k: (i, 0))
        st_spec = pl.BlockSpec((1, 1, Cout), lambda i, k: (i, 0, 0))
        scratch = [pltpu.VMEM((tm, Cout), jnp.float32)]

    out_shape = [jax.ShapeDtypeStruct((M, Cout), COMPUTE_DTYPE)]
    out_specs = [y_spec]
    if want_stats:
        out_shape += [jax.ShapeDtypeStruct((gm, 1, Cout), jnp.float32)] * 2
        out_specs += [st_spec, st_spec]

    kernel = _make_mm_kernel(tk=tk, nk=nk, want_stats=want_stats,
                             out_leaky=out_leaky, w_resident=w_res)

    return pl.pallas_call(
        kernel,
        out_shape=tuple(out_shape) if want_stats else out_shape[0],
        grid_spec=pltpu.PrefetchScalarGridSpec(
            num_scalar_prefetch=0, grid=grid,
            in_specs=[p_spec, w_spec],
            out_specs=out_specs if want_stats else out_specs[0],
            scratch_shapes=scratch),
        compiler_params=pltpu.CompilerParams(
            dimension_semantics=semantics, vmem_limit_bytes=_VMEM_LIMIT),
    )(patches, w_mat)


# ---------------------------------------------------------------------------
# JAX glue: im2col patch extraction + weight reshaping
# ---------------------------------------------------------------------------
def im2col_nhwc(x, k, stride, pad):
    N, H, W, C = x.shape
    xp = jnp.pad(x, ((0, 0), (pad, pad), (pad, pad), (0, 0)))
    Ho = (H + 2 * pad - k) // stride + 1
    Wo = (W + 2 * pad - k) // stride + 1
    cols = []
    for i in range(k):
        for j in range(k):
            cols.append(xp[:, i:i + stride * Ho:stride, j:j + stride * Wo:stride, :])
    p = jnp.stack(cols, axis=3)  # (N, Ho, Wo, k*k, C) -> tap-major, channel-minor
    return p.reshape(N * Ho * Wo, k * k * C), Ho, Wo


def w_oihw_to_mat(w):
    # PyTorch Conv2d weight (Cout, Cin, kh, kw) -> (kh*kw*Cin, Cout), im2col order.
    Cout, Cin, kh, kw = w.shape
    return jnp.transpose(w, (2, 3, 1, 0)).reshape(kh * kw * Cin, Cout)


# ---------------------------------------------------------------------------
# Discriminator forward (Pallas) and reference
# ---------------------------------------------------------------------------
def discriminator_forward(x_nchw, params):
    x = jnp.transpose(x_nchw, (0, 2, 3, 1)).astype(COMPUTE_DTYPE)   # NHWC bf16
    N = x.shape[0]

    # Block 0: Conv(img_ch -> base_ch, 4, 2, 1) + fused LeakyReLU (no BN).
    w = params["w0"]
    cout = w.shape[0]
    p, ho, wo = im2col_nhwc(x, 4, 2, 1)
    y = conv_block_pallas(p, w_oihw_to_mat(w).astype(COMPUTE_DTYPE),
                          want_stats=False, out_leaky=True)
    x = y.reshape(N, ho, wo, cout)                                  # bf16

    # Downsample blocks: Conv(ch -> 2ch, 4, 2, 1) + BN(batch stats) + LeakyReLU.
    for idx in range(params["n_downs"]):
        w = params[f"w{idx + 1}"]
        cout = w.shape[0]
        p, ho, wo = im2col_nhwc(x, 4, 2, 1)
        M = p.shape[0]
        y, psum, psq = conv_block_pallas(
            p, w_oihw_to_mat(w).astype(COMPUTE_DTYPE),
            want_stats=True, out_leaky=False)

        # Exact training-mode BatchNorm2d stats (biased variance) from the
        # f32 per-tile partials (no padded rows exist, so the sums are exact).
        mean = jnp.sum(psum, axis=(0, 1)) / M
        var = jnp.sum(psq, axis=(0, 1)) / M - mean * mean
        scale = params[f"g{idx + 1}"] * lax.rsqrt(var + BN_EPS)
        shift = params[f"b{idx + 1}"] - mean * scale

        # BN + LeakyReLU folded into the producer of the next layer's patch
        # matrix (fused by XLA with the im2col pad/slice/stack); no separate
        # Pallas elementwise pass and no f32 HBM round trip.
        y4 = y.reshape(N, ho, wo, cout).astype(jnp.float32)
        x = _leaky(y4 * scale + shift).astype(COMPUTE_DTYPE)

    # Final Conv(ch -> 1, 4, 1, 0): spatial 4x4 -> 1x1, Cout = 1.  A Pallas
    # launch is pure overhead for a lane-sparse (N, 1) result -> plain JAX dot.
    w = params["w_final"]
    p, _, _ = im2col_nhwc(x, 4, 1, 0)
    out = jnp.dot(p, w_oihw_to_mat(w).astype(COMPUTE_DTYPE),
                  preferred_element_type=jnp.float32)
    return out.reshape(N)   # == .view(x.size(0))


def ref_forward(x_nchw, params):
    # Same math (conv -> training-mode BN -> LeakyReLU(0.2)) with bf16 matmul
    # operands / f32 accumulation, via XLA's conv.
    def conv(x, w, stride, pad):
        return lax.conv_general_dilated(
            x.astype(COMPUTE_DTYPE), w.astype(COMPUTE_DTYPE),
            (stride, stride), [(pad, pad), (pad, pad)],
            dimension_numbers=("NCHW", "OIHW", "NCHW"),
            preferred_element_type=jnp.float32)

    x = conv(x_nchw, params["w0"], 2, 1)
    x = jnp.where(x > 0, x, LRELU_SLOPE * x)
    for idx in range(params["n_downs"]):
        x = conv(x, params[f"w{idx + 1}"], 2, 1)
        mean = jnp.mean(x, axis=(0, 2, 3), keepdims=True)
        var = jnp.mean((x - mean) ** 2, axis=(0, 2, 3), keepdims=True)  # biased
        x = (x - mean) * lax.rsqrt(var + BN_EPS)
        x = x * params[f"g{idx + 1}"].reshape(1, -1, 1, 1) \
            + params[f"b{idx + 1}"].reshape(1, -1, 1, 1)
        x = jnp.where(x > 0, x, LRELU_SLOPE * x)
    x = conv(x, params["w_final"], 1, 0)
    return x.reshape(x.shape[0])


# ---------------------------------------------------------------------------
# Deterministic parameter init (shapes from Discriminator.__init__)
# ---------------------------------------------------------------------------
def init_params(key, img_size, base_ch, img_ch):
    assert img_size & (img_size - 1) == 0 and img_size >= 32
    n_downs = int(math.log2(img_size)) - 3
    params = {"n_downs": n_downs}
    keys = iter(jax.random.split(key, 3 * n_downs + 2))

    def conv_w(k, cout, cin):
        fan_in = cin * 4 * 4
        return (jax.random.normal(k, (cout, cin, 4, 4), jnp.float32)
                / math.sqrt(fan_in))

    params["w0"] = conv_w(next(keys), base_ch, img_ch)
    ch = base_ch
    for i in range(n_downs):
        params[f"w{i + 1}"] = conv_w(next(keys), ch * 2, ch)
        params[f"g{i + 1}"] = 1.0 + 0.1 * jax.random.normal(next(keys), (ch * 2,), jnp.float32)
        params[f"b{i + 1}"] = 0.1 * jax.random.normal(next(keys), (ch * 2,), jnp.float32)
        ch *= 2
    params["w_final"] = conv_w(next(keys), 1, ch)
    return params


if __name__ == "__main__":
    IMG_SIZE, BASE_CH, IMG_CH, BATCH = 32, 16, 3, 2   # smallest valid img_size
    key = jax.random.PRNGKey(0)
    kx, kp = jax.random.split(key)
    x = jax.random.normal(kx, (BATCH, IMG_CH, IMG_SIZE, IMG_SIZE), jnp.float32)
    params = init_params(kp, IMG_SIZE, BASE_CH, IMG_CH)

    fwd = jax.jit(lambda xx: discriminator_forward(xx, params))
    out = jax.block_until_ready(fwd(x))
    assert out.shape == (BATCH,), out.shape

    ref = jax.block_until_ready(jax.jit(lambda xx: ref_forward(xx, params))(x))
    # bf16 activation storage adds one rounding point per BN layer relative to
    # the f32 reference path -> slightly looser tolerance than strict f32.
    np.testing.assert_allclose(np.asarray(out), np.asarray(ref), rtol=3e-2, atol=3e-2)
    print("KERNEL_OK")
</pallas_src>

<mosaic_0001>
module attributes {stable_mosaic.version = 11 : i64} {
  func.func @kernel(%arg0: i32, %arg1: memref<512x48xbf16, #tpu.memory_space<vmem>>, %arg2: memref<48x16xbf16, #tpu.memory_space<vmem>>, %arg3: memref<512x16xbf16, #tpu.memory_space<vmem>>) attributes {dimension_semantics = [#tpu.dimension_semantics<parallel>], iteration_bounds = array<i64: 1>, scalar_prefetch = 0 : i64, scratch_operands = 0 : i64, tpu.core_type = #tpu.core_type<tc>, window_params = [{transform_indices = @transform_0, window_bounds = array<i64: 512, 48>}, {pipeline_mode = #tpu.pipeline_mode<synchronous>, transform_indices = @transform_1, window_bounds = array<i64: 48, 16>}, {transform_indices = @transform_2, window_bounds = array<i64: 512, 16>}]} {
    %c0 = arith.constant 0 : index
    %c0_0 = arith.constant 0 : index
    %0 = vector.load %arg2[%c0, %c0_0] : memref<48x16xbf16, #tpu.memory_space<vmem>>, vector<48x16xbf16>
    %c0_1 = arith.constant 0 : index
    %c0_2 = arith.constant 0 : index
    %1 = vector.load %arg1[%c0_1, %c0_2] : memref<512x48xbf16, #tpu.memory_space<vmem>>, vector<512x48xbf16>
    %cst = arith.constant dense<0.000000e+00> : vector<512x16xf32>
    %2 = tpu.matmul %1, %0, %cst {dimension_numbers = #tpu.dot_dimension_numbers<[1], [0], [0], [1], [0, 0, 1, 1], [], []>} : vector<512x48xbf16>, vector<48x16xbf16>, vector<512x16xf32> -> vector<512x16xf32>
    %cst_3 = arith.constant 0.000000e+00 : f32
    %3 = vector.broadcast %cst_3 : f32 to vector<512x16xf32>
    %4 = arith.cmpf ogt, %2, %3 : vector<512x16xf32>
    %cst_4 = arith.constant 2.000000e-01 : f32
    %5 = vector.broadcast %cst_4 : f32 to vector<512x16xf32>
    %6 = arith.mulf %5, %2 : vector<512x16xf32>
    %7 = arith.select %4, %2, %6 : vector<512x16xi1>, vector<512x16xf32>
    %8 = arith.truncf %7 : vector<512x16xf32> to vector<512x16xbf16>
    %c0_5 = arith.constant 0 : index
    %c0_6 = arith.constant 0 : index
    %9 = vector.load %arg3[%c0_5, %c0_6] : memref<512x16xbf16, #tpu.memory_space<vmem>>, vector<512x16xbf16>
    tpu.vector_store %arg3[%c0_5, %c0_6], %8 {strides = array<i32>} : memref<512x16xbf16, #tpu.memory_space<vmem>>, vector<512x16xbf16>,
    return
  }
  func.func @transform_0(%arg0: i32) -> (i32, i32) {
    %c0_i32 = arith.constant 0 : i32
    %c0_i32_0 = arith.constant 0 : i32
    return %arg0, %c0_i32 : i32, i32
  }
  func.func @transform_1(%arg0: i32) -> (i32, i32) {
    %c0_i32 = arith.constant 0 : i32
    %c0_i32_0 = arith.constant 0 : i32
    %c0_i32_1 = arith.constant 0 : i32
    return %c0_i32, %c0_i32_0 : i32, i32
  }
  func.func @transform_2(%arg0: i32) -> (i32, i32) {
    %c0_i32 = arith.constant 0 : i32
    %c0_i32_0 = arith.constant 0 : i32
    return %arg0, %c0_i32 : i32, i32
  }
}

module attributes {stable_mosaic.version = 11 : i64} {
  func.func @kernel(%arg0: i32, %arg1: memref<128x256xbf16, #tpu.memory_space<vmem>>, %arg2: memref<256x32xbf16, #tpu.memory_space<vmem>>, %arg3: memref<128x32xbf16, #tpu.memory_space<vmem>>, %arg4: memref<1x1x32xf32, #tpu.memory_space<vmem>>, %arg5: memref<1x1x32xf32, #tpu.memory_space<vmem>>) attributes {dimension_semantics = [#tpu.dimension_semantics<parallel>], iteration_bounds = array<i64: 1>, scalar_prefetch = 0 : i64, scratch_operands = 0 : i64, tpu.core_type = #tpu.core_type<tc>, window_params = [{transform_indices = @transform_0, window_bounds = array<i64: 128, 256>}, {pipeline_mode = #tpu.pipeline_mode<synchronous>, transform_indices = @transform_1, window_bounds = array<i64: 256, 32>}, {transform_indices = @transform_2, window_bounds = array<i64: 128, 32>}, {transform_indices = @transform_3, window_bounds = array<i64: 1, 1, 32>}, {transform_indices = @transform_4, window_bounds = array<i64: 1, 1, 32>}]} {
    %c0 = arith.constant 0 : index
    %c0_0 = arith.constant 0 : index
    %0 = vector.load %arg2[%c0, %c0_0] : memref<256x32xbf16, #tpu.memory_space<vmem>>, vector<256x32xbf16>
    %c0_1 = arith.constant 0 : index
    %c0_2 = arith.constant 0 : index
    %1 = vector.load %arg1[%c0_1, %c0_2] : memref<128x256xbf16, #tpu.memory_space<vmem>>, vector<128x256xbf16>
    %cst = arith.constant dense<0.000000e+00> : vector<128x32xf32>
    %2 = tpu.matmul %1, %0, %cst {dimension_numbers = #tpu.dot_dimension_numbers<[1], [0], [0], [1], [0, 0, 1, 1], [], []>} : vector<128x256xbf16>, vector<256x32xbf16>, vector<128x32xf32> -> vector<128x32xf32>
    %3 = arith.truncf %2 : vector<128x32xf32> to vector<128x32xbf16>
    %c0_3 = arith.constant 0 : index
    %c0_4 = arith.constant 0 : index
    %4 = vector.load %arg3[%c0_3, %c0_4] : memref<128x32xbf16, #tpu.memory_space<vmem>>, vector<128x32xbf16>
    tpu.vector_store %arg3[%c0_3, %c0_4], %3 {strides = array<i32>} : memref<128x32xbf16, #tpu.memory_space<vmem>>, vector<128x32xbf16>,
    %cst_5 = arith.constant dense<0.000000e+00> : vector<32xf32>
    %5 = vector.multi_reduction <add>, %2, %cst_5 [0] : vector<128x32xf32> to vector<32xf32>
    %6 = vector.shape_cast %5 : vector<32xf32> to vector<1x32xf32>
    %c0_6 = arith.constant 0 : index
    %c0_7 = arith.constant 0 : index
    %c0_8 = arith.constant 0 : index
    %7 = vector.load %arg4[%c0_6, %c0_7, %c0_8] : memref<1x1x32xf32, #tpu.memory_space<vmem>>, vector<1x1x32xf32>
    %8 = vector.shape_cast %7 : vector<1x1x32xf32> to vector<1x32xf32>
    %9 = vector.shape_cast %6 : vector<1x32xf32> to vector<1x1x32xf32>
    tpu.vector_store %arg4[%c0_6, %c0_7, %c0_8], %9 {strides = array<i32>} : memref<1x1x32xf32, #tpu.memory_space<vmem>>, vector<1x1x32xf32>,
    %10 = arith.mulf %2, %2 : vector<128x32xf32>
    %cst_9 = arith.constant dense<0.000000e+00> : vector<32xf32>
    %11 = vector.multi_reduction <add>, %10, %cst_9 [0] : vector<128x32xf32> to vector<32xf32>
    %12 = vector.shape_cast %11 : vector<32xf32> to vector<1x32xf32>
    %c0_10 = arith.constant 0 : index
    %c0_11 = arith.constant 0 : index
    %c0_12 = arith.constant 0 : index
    %13 = vector.load %arg5[%c0_10, %c0_11, %c0_12] : memref<1x1x32xf32, #tpu.memory_space<vmem>>, vector<1x1x32xf32>
    %14 = vector.shape_cast %13 : vector<1x1x32xf32> to vector<1x32xf32>
    %15 = vector.shape_cast %12 : vector<1x32xf32> to vector<1x1x32xf32>
    tpu.vector_store %arg5[%c0_10, %c0_11, %c0_12], %15 {strides = array<i32>} : memref<1x1x32xf32, #tpu.memory_space<vmem>>, vector<1x1x32xf32>,
    return
  }
  func.func @transform_0(%arg0: i32) -> (i32, i32) {
    %c0_i32 = arith.constant 0 : i32
    %c0_i32_0 = arith.constant 0 : i32
    return %arg0, %c0_i32 : i32, i32
  }
  func.func @transform_1(%arg0: i32) -> (i32, i32) {
    %c0_i32 = arith.constant 0 : i32
    %c0_i32_0 = arith.constant 0 : i32
    %c0_i32_1 = arith.constant 0 : i32
    return %c0_i32, %c0_i32_0 : i32, i32
  }
  func.func @transform_2(%arg0: i32) -> (i32, i32) {
    %c0_i32 = arith.constant 0 : i32
    %c0_i32_0 = arith.constant 0 : i32
    return %arg0, %c0_i32 : i32, i32
  }
  func.func @transform_3(%arg0: i32) -> (i32, i32, i32) {
    %c0_i32 = arith.constant 0 : i32
    %c0_i32_0 = arith.constant 0 : i32
    %c0_i32_1 = arith.constant 0 : i32
    return %arg0, %c0_i32, %c0_i32_0 : i32, i32, i32
  }
  func.func @transform_4(%arg0: i32) -> (i32, i32, i32) {
    %c0_i32 = arith.constant 0 : i32
    %c0_i32_0 = arith.constant 0 : i32
    %c0_i32_1 = arith.constant 0 : i32
    return %arg0, %c0_i32, %c0_i32_0 : i32, i32, i32
  }
}

module attributes {stable_mosaic.version = 11 : i64} {
  func.func @kernel(%arg0: i32, %arg1: memref<32x512xbf16, #tpu.memory_space<vmem>>, %arg2: memref<512x64xbf16, #tpu.memory_space<vmem>>, %arg3: memref<32x64xbf16, #tpu.memory_space<vmem>>, %arg4: memref<1x1x64xf32, #tpu.memory_space<vmem>>, %arg5: memref<1x1x64xf32, #tpu.memory_space<vmem>>) attributes {dimension_semantics = [#tpu.dimension_semantics<parallel>], iteration_bounds = array<i64: 1>, scalar_prefetch = 0 : i64, scratch_operands = 0 : i64, tpu.core_type = #tpu.core_type<tc>, window_params = [{transform_indices = @transform_0, window_bounds = array<i64: 32, 512>}, {pipeline_mode = #tpu.pipeline_mode<synchronous>, transform_indices = @transform_1, window_bounds = array<i64: 512, 64>}, {transform_indices = @transform_2, window_bounds = array<i64: 32, 64>}, {transform_indices = @transform_3, window_bounds = array<i64: 1, 1, 64>}, {transform_indices = @transform_4, window_bounds = array<i64: 1, 1, 64>}]} {
    %c0 = arith.constant 0 : index
    %c0_0 = arith.constant 0 : index
    %0 = vector.load %arg2[%c0, %c0_0] : memref<512x64xbf16, #tpu.memory_space<vmem>>, vector<512x64xbf16>
    %c0_1 = arith.constant 0 : index
    %c0_2 = arith.constant 0 : index
    %1 = vector.load %arg1[%c0_1, %c0_2] : memref<32x512xbf16, #tpu.memory_space<vmem>>, vector<32x512xbf16>
    %cst = arith.constant dense<0.000000e+00> : vector<32x64xf32>
    %2 = tpu.matmul %1, %0, %cst {dimension_numbers = #tpu.dot_dimension_numbers<[1], [0], [0], [1], [0, 0, 1, 1], [], []>} : vector<32x512xbf16>, vector<512x64xbf16>, vector<32x64xf32> -> vector<32x64xf32>
    %3 = arith.truncf %2 : vector<32x64xf32> to vector<32x64xbf16>
    %c0_3 = arith.constant 0 : index
    %c0_4 = arith.constant 0 : index
    %4 = vector.load %arg3[%c0_3, %c0_4] : memref<32x64xbf16, #tpu.memory_space<vmem>>, vector<32x64xbf16>
    tpu.vector_store %arg3[%c0_3, %c0_4], %3 {strides = array<i32>} : memref<32x64xbf16, #tpu.memory_space<vmem>>, vector<32x64xbf16>,
    %cst_5 = arith.constant dense<0.000000e+00> : vector<64xf32>
    %5 = vector.multi_reduction <add>, %2, %cst_5 [0] : vector<32x64xf32> to vector<64xf32>
    %6 = vector.shape_cast %5 : vector<64xf32> to vector<1x64xf32>
    %c0_6 = arith.constant 0 : index
    %c0_7 = arith.constant 0 : index
    %c0_8 = arith.constant 0 : index
    %7 = vector.load %arg4[%c0_6, %c0_7, %c0_8] : memref<1x1x64xf32, #tpu.memory_space<vmem>>, vector<1x1x64xf32>
    %8 = vector.shape_cast %7 : vector<1x1x64xf32> to vector<1x64xf32>
    %9 = vector.shape_cast %6 : vector<1x64xf32> to vector<1x1x64xf32>
    tpu.vector_store %arg4[%c0_6, %c0_7, %c0_8], %9 {strides = array<i32>} : memref<1x1x64xf32, #tpu.memory_space<vmem>>, vector<1x1x64xf32>,
    %10 = arith.mulf %2, %2 : vector<32x64xf32>
    %cst_9 = arith.constant dense<0.000000e+00> : vector<64xf32>
    %11 = vector.multi_reduction <add>, %10, %cst_9 [0] : vector<32x64xf32> to vector<64xf32>
    %12 = vector.shape_cast %11 : vector<64xf32> to vector<1x64xf32>
    %c0_10 = arith.constant 0 : index
    %c0_11 = arith.constant 0 : index
    %c0_12 = arith.constant 0 : index
    %13 = vector.load %arg5[%c0_10, %c0_11, %c0_12] : memref<1x1x64xf32, #tpu.memory_space<vmem>>, vector<1x1x64xf32>
    %14 = vector.shape_cast %13 : vector<1x1x64xf32> to vector<1x64xf32>
    %15 = vector.shape_cast %12 : vector<1x64xf32> to vector<1x1x64xf32>
    tpu.vector_store %arg5[%c0_10, %c0_11, %c0_12], %15 {strides = array<i32>} : memref<1x1x64xf32, #tpu.memory_space<vmem>>, vector<1x1x64xf32>,
    return
  }
  func.func @transform_0(%arg0: i32) -> (i32, i32) {
    %c0_i32 = arith.constant 0 : i32
    %c0_i32_0 = arith.constant 0 : i32
    return %arg0, %c0_i32 : i32, i32
  }
  func.func @transform_1(%arg0: i32) -> (i32, i32) {
    %c0_i32 = arith.constant 0 : i32
    %c0_i32_0 = arith.constant 0 : i32
    %c0_i32_1 = arith.constant 0 : i32
    return %c0_i32, %c0_i32_0 : i32, i32
  }
  func.func @transform_2(%arg0: i32) -> (i32, i32) {
    %c0_i32 = arith.constant 0 : i32
    %c0_i32_0 = arith.constant 0 : i32
    return %arg0, %c0_i32 : i32, i32
  }
  func.func @transform_3(%arg0: i32) -> (i32, i32, i32) {
    %c0_i32 = arith.constant 0 : i32
    %c0_i32_0 = arith.constant 0 : i32
    %c0_i32_1 = arith.constant 0 : i32
    return %arg0, %c0_i32, %c0_i32_0 : i32, i32, i32
  }
  func.func @transform_4(%arg0: i32) -> (i32, i32, i32) {
    %c0_i32 = arith.constant 0 : i32
    %c0_i32_0 = arith.constant 0 : i32
    %c0_i32_1 = arith.constant 0 : i32
    return %arg0, %c0_i32, %c0_i32_0 : i32, i32, i32
  }
}

</mosaic_0001>

<bundles_post_ra>
// kernel: _lambda_.3
= control target key start
LH: loop header
LB: loop body
LE: loop exit
PB: predicated region body
PF: predicated region fallthrough
CT: control target
= control target key end

     0   :  { %vm260_vm0 = vcmask 392192   ;;  %vm1094_vm3 = vcmask 125952   ;;  %s1913_s1 = inlined_call_operand.vmem [shape: bf16[48,16], index: 1, kind: input, shape index: {}]   ;;  %s1914_s0 = inlined_call_operand.vmem [shape: bf16[512,48], index: 0, kind: input, shape index: {}]   ;;  %s1915_s2 = inlined_call_operand.vmem [shape: bf16[512,16], index: 2, kind: output, shape index: {}]  }
   0x1   :  { %v1469_v0 = vld [vmem:[%s1913_s1] sm:$0xff]   ;;  %v1470_v1 = vld [vmem:[%s1913_s1 + $0x8] sm:$0xff]   ;;  %v1471_v2 = vld [vmem:[%s1913_s1 + $0x10] sm:$0xff]  }
   0x2   :  { %1393 = vmatprep.subr.bf16.mxu0 %v1469_v0  ;;  %1463 = vmatprep.subr.bf16.mxu1 %v1469_v0  ;;  %v1472_v3 = vld [vmem:[%s1914_s0] sm:$0xff]   ;;  %v1474_v5 = vld [vmem:[%s1914_s0 + $0x8] sm:$0xff]   ;;  %v1476_v7 = vld [vmem:[%s1914_s0 + $0x10] sm:$0xff]  }
   0x3   :  { %1394 = vmatpush3.bf16.msra.mxu0 %v1469_v0  ;;  %1466 = vmatpush3.bf16.msra.mxu1 %v1469_v0  ;;  %v1473_v4 = vld [vmem:[%s1914_s0 + $0x80] sm:$0xff]   ;;  %v1475_v6 = vld [vmem:[%s1914_s0 + $0x88] sm:$0xff]   ;;  %v1477_v8 = vld [vmem:[%s1914_s0 + $0x90] sm:$0xff]  }
   0x4   :  { %1395 = vmatprep.subr.bf16.mxu0 %v1470_v1  ;;  %1464 = vmatprep.subr.bf16.mxu1 %v1470_v1  ;;  %v1478_v9 = vld [vmem:[%s1914_s0 + $0x18] sm:$0xff]   ;;  %v1480_v11 = vld [vmem:[%s1914_s0 + $0x20] sm:$0xff]   ;;  %v1482_v13 = vld [vmem:[%s1914_s0 + $0x28] sm:$0xff]  }
   0x5   :  { %1399 = vmatprep.mubr.msk.bf16.mxu0 %vm260_vm0, %v1472_v3  ;;  %1431 = vmatprep.mubr.msk.bf16.mxu1 %vm260_vm0, %v1473_v4  ;;  %v1479_v10 = vld [vmem:[%s1914_s0 + $0x98] sm:$0xff]   ;;  %v1481_v12 = vld [vmem:[%s1914_s0 + $0xa0] sm:$0xff]   ;;  %v1483_v14 = vld [vmem:[%s1914_s0 + $0xa8] sm:$0xff]  }
   0x6   :  { %v1484_v15 = vld [vmem:[%s1914_s0 + $0x30] sm:$0xff]   ;;  %v1486_v17 = vld [vmem:[%s1914_s0 + $0x38] sm:$0xff]   ;;  %v1488_v19 = vld [vmem:[%s1914_s0 + $0x40] sm:$0xff]  }
   0x7   :  { %1396 = vmatpush3.bf16.msra.mxu0 %v1470_v1  ;;  %1467 = vmatpush3.bf16.msra.mxu1 %v1470_v1  ;;  %v1485_v16 = vld [vmem:[%s1914_s0 + $0xb0] sm:$0xff]   ;;  %v1487_v18 = vld [vmem:[%s1914_s0 + $0xb8] sm:$0xff]   ;;  %v1489_v20 = vld [vmem:[%s1914_s0 + $0xc0] sm:$0xff]  }
   0x8   :  { %1397 = vmatprep.subr.bf16.mxu0 %v1471_v2  ;;  %1465 = vmatprep.subr.bf16.mxu1 %v1471_v2  ;;  %v1490_v21 = vld [vmem:[%s1914_s0 + $0x48] sm:$0xff]   ;;  %v1492_v23 = vld [vmem:[%s1914_s0 + $0x50] sm:$0xff]   ;;  %v1494_v25 = vld [vmem:[%s1914_s0 + $0x58] sm:$0xff]  }
   0x9   :  { %v1491_v22 = vld [vmem:[%s1914_s0 + $0xc8] sm:$0xff]   ;;  %v1493_v24 = vld [vmem:[%s1914_s0 + $0xd0] sm:$0xff]   ;;  %v1495_v26 = vld [vmem:[%s1914_s0 + $0xd8] sm:$0xff]  }
   0xa   :  { %v1496_v27 = vld [vmem:[%s1914_s0 + $0x60] sm:$0xff]   ;;  %v1498_v29 = vld [vmem:[%s1914_s0 + $0x68] sm:$0xff]   ;;  %v1500_v31 = vld [vmem:[%s1914_s0 + $0x70] sm:$0xff]  }
   0xb   :  { %1398 = vmatpush3.bf16.msra.mxu0 %v1471_v2  ;;  %1468 = vmatpush3.bf16.msra.mxu1 %v1471_v2  ;;  %v1497_v28 = vld [vmem:[%s1914_s0 + $0xe0] sm:$0xff]   ;;  %v1499_v30 = vld [vmem:[%s1914_s0 + $0xe8] sm:$0xff]   ;;  %v1501_v32 = vld [vmem:[%s1914_s0 + $0xf0] sm:$0xff]  }
   0xc   :  { %v1502_v33 = vld [vmem:[%s1914_s0 + $0x78] sm:$0xff]  }
   0xd   :  { %v1503_v34 = vld [vmem:[%s1914_s0 + $0xf8] sm:$0xff]  }
   0xe   :  { %1400 = vmatmul.mubr.msk.bf16.vlgmr.msra.gmra.mrb[0].mxu0 %vm260_vm0, %v1474_v5  ;;  %1432 = vmatmul.mubr.msk.bf16.vlgmr.msra.gmra.mrb[0].mxu1 %vm260_vm0, %v1475_v6 }
   0xf   :  { %1403 = vmatprep.mubr.msk.bf16.mxu0 %vm260_vm0, %v1476_v7  ;;  %1435 = vmatprep.mubr.msk.bf16.mxu1 %vm260_vm0, %v1477_v8 }
  0x16   :  { %1404 = vmatmul.mubr.msk.bf16.gmra.mrb[4].mxu0 %vm260_vm0, %v1478_v9  ;;  %1436 = vmatmul.mubr.msk.bf16.gmra.mrb[4].mxu1 %vm260_vm0, %v1479_v10 }
  0x17   :  { %1407 = vmatprep.mubr.msk.bf16.mxu0 %vm260_vm0, %v1480_v11  ;;  %1439 = vmatprep.mubr.msk.bf16.mxu1 %vm260_vm0, %v1481_v12 }
  0x1e   :  { %1408 = vmatmul.mubr.msk.bf16.gmra.mrb[8].mxu0 %vm260_vm0, %v1482_v13  ;;  %1440 = vmatmul.mubr.msk.bf16.gmra.mrb[8].mxu1 %vm260_vm0, %v1483_v14 }
  0x1f   :  { %1411 = vmatprep.mubr.msk.bf16.mxu0 %vm260_vm0, %v1484_v15  ;;  %1443 = vmatprep.mubr.msk.bf16.mxu1 %vm260_vm0, %v1485_v16 }
  0x26   :  { %1412 = vmatmul.mubr.msk.bf16.gmra.mrb[12].mxu0 %vm260_vm0, %v1486_v17  ;;  %1444 = vmatmul.mubr.msk.bf16.gmra.mrb[12].mxu1 %vm260_vm0, %v1487_v18 }
  0x27   :  { %1415 = vmatprep.mubr.msk.bf16.mxu0 %vm260_vm0, %v1488_v19  ;;  %1447 = vmatprep.mubr.msk.bf16.mxu1 %vm260_vm0, %v1489_v20 }
  0x2e   :  { %1416 = vmatmul.mubr.msk.bf16.gmra.mrb[16].mxu0 %vm260_vm0, %v1490_v21  ;;  %1448 = vmatmul.mubr.msk.bf16.gmra.mrb[16].mxu1 %vm260_vm0, %v1491_v22 }
  0x2f   :  { %1419 = vmatprep.mubr.msk.bf16.mxu0 %vm260_vm0, %v1492_v23  ;;  %1451 = vmatprep.mubr.msk.bf16.mxu1 %vm260_vm0, %v1493_v24 }
  0x36   :  { %1420 = vmatmul.mubr.msk.bf16.gmra.mrb[20].mxu0 %vm260_vm0, %v1494_v25  ;;  %1452 = vmatmul.mubr.msk.bf16.gmra.mrb[20].mxu1 %vm260_vm0, %v1495_v26 }
  0x37   :  { %1423 = vmatprep.mubr.msk.bf16.mxu0 %vm260_vm0, %v1496_v27  ;;  %1455 = vmatprep.mubr.msk.bf16.mxu1 %vm260_vm0, %v1497_v28 }
  0x3e   :  { %1424 = vmatmul.mubr.msk.bf16.gmra.mrb[24].mxu0 %vm260_vm0, %v1498_v29  ;;  %1456 = vmatmul.mubr.msk.bf16.gmra.mrb[24].mxu1 %vm260_vm0, %v1499_v30 }
  0x3f   :  { %1427 = vmatprep.mubr.msk.bf16.mxu0 %vm260_vm0, %v1500_v31  ;;  %1459 = vmatprep.mubr.msk.bf16.mxu1 %vm260_vm0, %v1501_v32 }
  0x46   :  { %1428 = vmatmul.mubr.msk.bf16.gmra.mrb[28].mxu0 %vm260_vm0, %v1502_v33  ;;  %1460 = vmatmul.mubr.msk.bf16.gmra.mrb[28].mxu1 %vm260_vm0, %v1503_v34 }
  0xe1   :  { %v1401_v35 = vpop.f32.mrb[0].mxu0  ;;  %v1433_v36 = vpop.f32.mrb[0].mxu1 }
  0xe2   :  { %vm648_vm1 = vcmp.gt.f32.partialorder %v1401_v35, 0.0  ;;  %v712_v37 = vmul.f32 0.2, %v1401_v35  ;;  %vm680_vm2 = vcmp.gt.f32.partialorder %v1433_v36, 0.0  ;;  %v744_v38 = vmul.f32 0.2, %v1433_v36 }
  0xe3   :  { %v391_v39 = vpop.f32.mrb[1].mxu0  ;;  %v519_v40 = vpop.f32.mrb[1].mxu1 }
  0xe4   :  { %v776_v41 = vsel %vm648_vm1, %v1401_v35, %v712_v37  ;;  %v808_v42 = vsel %vm680_vm2, %v1433_v36, %v744_v38  ;;  %vm646_vm4 = vcmp.gt.f32.partialorder %v391_v39, 0.0  ;;  %v710_v43 = vmul.f32 0.2, %v391_v39  ;;  %v1402_v44 = vpop.f32.mrb[2].mxu0  ;;  %v1434_v45 = vpop.f32.mrb[2].mxu1 }
  0xe5   :  { %v1296_v46 = vpack.c.bf16 %v776_v41, %v776_v41  ;;  %v1328_v47 = vpack.c.bf16 %v808_v42, %v808_v42  ;;  %vm678_vm5 = vcmp.gt.f32.partialorder %v519_v40, 0.0  ;;  %v742_v48 = vmul.f32 0.2, %v519_v40  ;;  %v394_v49 = vpop.f32.mrb[3].mxu0  ;;  %v522_v50 = vpop.f32.mrb[3].mxu1 }
  0xe6   :  { %v774_v51 = vsel %vm646_vm4, %v391_v39, %v710_v43  ;;  %vm649_vm6 = vcmp.gt.f32.partialorder %v1402_v44, 0.0  ;;  %v713_v52 = vmul.f32 0.2, %v1402_v44  ;;  %vm681_vm7 = vcmp.gt.f32.partialorder %v1434_v45, 0.0 }
  0xe7   :  { %1097 = vst.msk [vmem:[%s1915_s2 + $0x8] sm:$0xf] %vm1094_vm3, %v1296_v46  ;;  %1129 = vst.msk [vmem:[%s1915_s2 + $0x88] sm:$0xf] %vm1094_vm3, %v1328_v47  ;;  %v1294_v53 = vpack.c.bf16 %v774_v51, %v774_v51  ;;  %v806_v54 = vsel %vm678_vm5, %v519_v40, %v742_v48  ;;  %v745_v55 = vmul.f32 0.2, %v1434_v45 }
  0xe8   :  { %vm647_vm8 = vcmp.gt.f32.partialorder %v394_v49, 0.0  ;;  %v1326_v56 = vpack.c.bf16 %v806_v54, %v806_v54  ;;  %v777_v57 = vsel %vm649_vm6, %v1402_v44, %v713_v52  ;;  %v711_v58 = vmul.f32 0.2, %v394_v49 }
  0xe9   :  { %vm679_vm9 = vcmp.gt.f32.partialorder %v522_v50, 0.0  ;;  %1095 = vst.msk [vmem:[%s1915_s2] sm:$0xf] %vm1094_vm3, %v1294_v53  ;;  %v1297_v59 = vpack.c.bf16 %v777_v57, %v777_v57  ;;  %v809_v60 = vsel %vm681_vm7, %v1434_v45, %v745_v55  ;;  %v743_v61 = vmul.f32 0.2, %v522_v50  ;;  %v1405_v62 = vpop.f32.mrb[4].mxu0 }
  0xea   :  { %v1437_v63 = vpop.f32.mrb[4].mxu1  ;;  %1127 = vst.msk [vmem:[%s1915_s2 + $0x80] sm:$0xf] %vm1094_vm3, %v1326_v56  ;;  %v1329_v0 = vpack.c.bf16 %v809_v60, %v809_v60  ;;  %v775_v1 = vsel %vm647_vm8, %v394_v49, %v711_v58  ;;  %vm652_vm10 = vcmp.gt.f32.partialorder %v1405_v62, 0.0  ;;  %v716_v2 = vmul.f32 0.2, %v1405_v62 }
  0xeb   :  { %v407_v3 = vpop.f32.mrb[5].mxu0  ;;  %v535_v4 = vpop.f32.mrb[5].mxu1  ;;  %1098 = vst.msk [vmem:[%s1915_s2 + $0xc] sm:$0xf] %vm1094_vm3, %v1297_v59  ;;  %v1295_v5 = vpack.c.bf16 %v775_v1, %v775_v1  ;;  %v807_v6 = vsel %vm679_vm9, %v522_v50, %v743_v61  ;;  %vm684_vm11 = vcmp.gt.f32.partialorder %v1437_v63, 0.0 }
  0xec   :  { %v748_v7 = vmul.f32 0.2, %v1437_v63  ;;  %v1406_v8 = vpop.f32.mrb[6].mxu0  ;;  %v1438_v9 = vpop.f32.mrb[6].mxu1  ;;  %1130 = vst.msk [vmem:[%s1915_s2 + $0x8c] sm:$0xf] %vm1094_vm3, %v1329_v0  ;;  %v1327_v10 = vpack.c.bf16 %v807_v6, %v807_v6  ;;  %v780_v11 = vsel %vm652_vm10, %v1405_v62, %v716_v2 }
  0xed   :  { %vm650_vm12 = vcmp.gt.f32.partialorder %v407_v3, 0.0  ;;  %v714_v12 = vmul.f32 0.2, %v407_v3  ;;  %v410_v13 = vpop.f32.mrb[7].mxu0  ;;  %v538_v14 = vpop.f32.mrb[7].mxu1  ;;  %v1300_v15 = vpack.c.bf16 %v780_v11, %v780_v11  ;;  %vm682_vm13 = vcmp.gt.f32.partialorder %v535_v4, 0.0 }
  0xee   :  { %1096 = vst.msk [vmem:[%s1915_s2 + $0x4] sm:$0xf] %vm1094_vm3, %v1295_v5  ;;  %v812_v16 = vsel %vm684_vm11, %v1437_v63, %v748_v7  ;;  %v746_v17 = vmul.f32 0.2, %v535_v4  ;;  %1128 = vst.msk [vmem:[%s1915_s2 + $0x84] sm:$0xf] %vm1094_vm3, %v1327_v10 }
  0xef   :  { %v1332_v18 = vpack.c.bf16 %v812_v16, %v812_v16  ;;  %v778_v19 = vsel %vm650_vm12, %v407_v3, %v714_v12  ;;  %vm653_vm14 = vcmp.gt.f32.partialorder %v1406_v8, 0.0  ;;  %v717_v20 = vmul.f32 0.2, %v1406_v8  ;;  %1101 = vst.msk [vmem:[%s1915_s2 + $0x18] sm:$0xf] %vm1094_vm3, %v1300_v15 }
  0xf0   :  { %v1298_v21 = vpack.c.bf16 %v778_v19, %v778_v19  ;;  %v810_v22 = vsel %vm682_vm13, %v535_v4, %v746_v17  ;;  %vm685_vm15 = vcmp.gt.f32.partialorder %v1438_v9, 0.0  ;;  %v749_v23 = vmul.f32 0.2, %v1438_v9 }
  0xf1   :  { %1133 = vst.msk [vmem:[%s1915_s2 + $0x98] sm:$0xf] %vm1094_vm3, %v1332_v18  ;;  %v1330_v24 = vpack.c.bf16 %v810_v22, %v810_v22  ;;  %v781_v25 = vsel %vm653_vm14, %v1406_v8, %v717_v20  ;;  %vm651_vm0 = vcmp.gt.f32.partialorder %v410_v13, 0.0  ;;  %v715_v26 = vmul.f32 0.2, %v410_v13  ;;  %v1409_v30 = vpop.f32.mrb[8].mxu0 }
  0xf2   :  { %1099 = vst.msk [vmem:[%s1915_s2 + $0x10] sm:$0xf] %vm1094_vm3, %v1298_v21  ;;  %v1301_v27 = vpack.c.bf16 %v781_v25, %v781_v25  ;;  %v813_v28 = vsel %vm685_vm15, %v1438_v9, %v749_v23  ;;  %vm683_vm1 = vcmp.gt.f32.partialorder %v538_v14, 0.0  ;;  %v747_v29 = vmul.f32 0.2, %v538_v14  ;;  %v1441_v31 = vpop.f32.mrb[8].mxu1 }
  0xf3   :  { %1131 = vst.msk [vmem:[%s1915_s2 + $0x90] sm:$0xf] %vm1094_vm3, %v1330_v24  ;;  %v1333_v32 = vpack.c.bf16 %v813_v28, %v813_v28  ;;  %v779_v33 = vsel %vm651_vm0, %v410_v13, %v715_v26  ;;  %vm656_vm2 = vcmp.gt.f32.partialorder %v1409_v30, 0.0  ;;  %v720_v34 = vmul.f32 0.2, %v1409_v30  ;;  %v423_v35 = vpop.f32.mrb[9].mxu0 }
  0xf4   :  { %v551_v36 = vpop.f32.mrb[9].mxu1  ;;  %1102 = vst.msk [vmem:[%s1915_s2 + $0x1c] sm:$0xf] %vm1094_vm3, %v1301_v27  ;;  %v1299_v37 = vpack.c.bf16 %v779_v33, %v779_v33  ;;  %v811_v38 = vsel %vm683_vm1, %v538_v14, %v747_v29  ;;  %vm688_vm4 = vcmp.gt.f32.partialorder %v1441_v31, 0.0  ;;  %v752_v39 = vmul.f32 0.2, %v1441_v31 }
  0xf5   :  { %v1410_v40 = vpop.f32.mrb[10].mxu0  ;;  %v1442_v41 = vpop.f32.mrb[10].mxu1  ;;  %1134 = vst.msk [vmem:[%s1915_s2 + $0x9c] sm:$0xf] %vm1094_vm3, %v1333_v32  ;;  %v1331_v42 = vpack.c.bf16 %v811_v38, %v811_v38  ;;  %v784_v43 = vsel %vm656_vm2, %v1409_v30, %v720_v34  ;;  %vm654_vm5 = vcmp.gt.f32.partialorder %v423_v35, 0.0  ;;  %vm686_vm6 = vcmp.gt.f32.partialorder %v551_v36, 0.0 }
  0xf6   :  { %v718_v44 = vmul.f32 0.2, %v423_v35  ;;  %v426_v45 = vpop.f32.mrb[11].mxu0  ;;  %v554_v46 = vpop.f32.mrb[11].mxu1  ;;  %1100 = vst.msk [vmem:[%s1915_s2 + $0x14] sm:$0xf] %vm1094_vm3, %v1299_v37  ;;  %v1304_v47 = vpack.c.bf16 %v784_v43, %v784_v43  ;;  %v816_v48 = vsel %vm688_vm4, %v1441_v31, %v752_v39 }
  0xf7   :  { %v750_v49 = vmul.f32 0.2, %v551_v36  ;;  %1132 = vst.msk [vmem:[%s1915_s2 + $0x94] sm:$0xf] %vm1094_vm3, %v1331_v42  ;;  %v1336_v50 = vpack.c.bf16 %v816_v48, %v816_v48  ;;  %vm657_vm7 = vcmp.gt.f32.partialorder %v1410_v40, 0.0  ;;  %vm689_vm8 = vcmp.gt.f32.partialorder %v1442_v41, 0.0 }
  0xf8   :  { %v782_v51 = vsel %vm654_vm5, %v423_v35, %v718_v44  ;;  %v721_v52 = vmul.f32 0.2, %v1410_v40  ;;  %1105 = vst.msk [vmem:[%s1915_s2 + $0x28] sm:$0xf] %vm1094_vm3, %v1304_v47  ;;  %v753_v55 = vmul.f32 0.2, %v1442_v41 }
  0xf9   :  { %v1302_v53 = vpack.c.bf16 %v782_v51, %v782_v51  ;;  %v814_v54 = vsel %vm686_vm6, %v551_v36, %v750_v49  ;;  %1137 = vst.msk [vmem:[%s1915_s2 + $0xa8] sm:$0xf] %vm1094_vm3, %v1336_v50  ;;  %vm655_vm9 = vcmp.gt.f32.partialorder %v426_v45, 0.0  ;;  %v719_v58 = vmul.f32 0.2, %v426_v45  ;;  %v1413_v62 = vpop.f32.mrb[12].mxu0 }
  0xfa   :  { %v1334_v56 = vpack.c.bf16 %v814_v54, %v814_v54  ;;  %v785_v57 = vsel %vm657_vm7, %v1410_v40, %v721_v52  ;;  %v817_v60 = vsel %vm689_vm8, %v1442_v41, %v753_v55  ;;  %vm687_vm10 = vcmp.gt.f32.partialorder %v554_v46, 0.0  ;;  %v1445_v63 = vpop.f32.mrb[12].mxu1  ;;  %v439_v3 = vpop.f32.mrb[13].mxu0 }
  0xfb   :  { %1103 = vst.msk [vmem:[%s1915_s2 + $0x20] sm:$0xf] %vm1094_vm3, %v1302_v53  ;;  %v1305_v59 = vpack.c.bf16 %v785_v57, %v785_v57  ;;  %v751_v61 = vmul.f32 0.2, %v554_v46  ;;  %v1337_v0 = vpack.c.bf16 %v817_v60, %v817_v60  ;;  %v783_v1 = vsel %vm655_vm9, %v426_v45, %v719_v58  ;;  %v567_v4 = vpop.f32.mrb[13].mxu1  ;;  %v1414_v8 = vpop.f32.mrb[14].mxu0 }
  0xfc   :  { %1135 = vst.msk [vmem:[%s1915_s2 + $0xa0] sm:$0xf] %vm1094_vm3, %v1334_v56  ;;  %vm660_vm11 = vcmp.gt.f32.partialorder %v1413_v62, 0.0  ;;  %v724_v2 = vmul.f32 0.2, %v1413_v62  ;;  %v1303_v5 = vpack.c.bf16 %v783_v1, %v783_v1  ;;  %vm692_vm12 = vcmp.gt.f32.partialorder %v1445_v63, 0.0 }
  0xfd   :  { %1106 = vst.msk [vmem:[%s1915_s2 + $0x2c] sm:$0xf] %vm1094_vm3, %v1305_v59  ;;  %v815_v6 = vsel %vm687_vm10, %v554_v46, %v751_v61  ;;  %v756_v7 = vmul.f32 0.2, %v1445_v63  ;;  %v1446_v9 = vpop.f32.mrb[14].mxu1  ;;  %vm658_vm13 = vcmp.gt.f32.partialorder %v439_v3, 0.0 }
  0xfe   :  { %1138 = vst.msk [vmem:[%s1915_s2 + $0xac] sm:$0xf] %vm1094_vm3, %v1337_v0  ;;  %v1335_v10 = vpack.c.bf16 %v815_v6, %v815_v6  ;;  %v788_v11 = vsel %vm660_vm11, %v1413_v62, %v724_v2  ;;  %v722_v12 = vmul.f32 0.2, %v439_v3  ;;  %v442_v13 = vpop.f32.mrb[15].mxu0  ;;  %v570_v14 = vpop.f32.mrb[15].mxu1 }
  0xff   :  { %1104 = vst.msk [vmem:[%s1915_s2 + $0x24] sm:$0xf] %vm1094_vm3, %v1303_v5  ;;  %v1308_v15 = vpack.c.bf16 %v788_v11, %v788_v11  ;;  %v820_v16 = vsel %vm692_vm12, %v1445_v63, %v756_v7  ;;  %vm690_vm14 = vcmp.gt.f32.partialorder %v567_v4, 0.0  ;;  %v754_v17 = vmul.f32 0.2, %v567_v4 }
 0x100   :  { %1136 = vst.msk [vmem:[%s1915_s2 + $0xa4] sm:$0xf] %vm1094_vm3, %v1335_v10  ;;  %v1340_v18 = vpack.c.bf16 %v820_v16, %v820_v16  ;;  %v786_v19 = vsel %vm658_vm13, %v439_v3, %v722_v12  ;;  %vm661_vm15 = vcmp.gt.f32.partialorder %v1414_v8, 0.0  ;;  %v725_v20 = vmul.f32 0.2, %v1414_v8 }
 0x101   :  { %1109 = vst.msk [vmem:[%s1915_s2 + $0x38] sm:$0xf] %vm1094_vm3, %v1308_v15  ;;  %v1306_v21 = vpack.c.bf16 %v786_v19, %v786_v19  ;;  %v818_v22 = vsel %vm690_vm14, %v567_v4, %v754_v17  ;;  %vm693_vm0 = vcmp.gt.f32.partialorder %v1446_v9, 0.0  ;;  %v757_v23 = vmul.f32 0.2, %v1446_v9  ;;  %v1417_v30 = vpop.f32.mrb[16].mxu0 }
 0x102   :  { %1141 = vst.msk [vmem:[%s1915_s2 + $0xb8] sm:$0xf] %vm1094_vm3, %v1340_v18  ;;  %v1338_v24 = vpack.c.bf16 %v818_v22, %v818_v22  ;;  %v789_v25 = vsel %vm661_vm15, %v1414_v8, %v725_v20  ;;  %vm659_vm1 = vcmp.gt.f32.partialorder %v442_v13, 0.0  ;;  %v723_v26 = vmul.f32 0.2, %v442_v13  ;;  %v1449_v31 = vpop.f32.mrb[16].mxu1 }
 0x103   :  { %1107 = vst.msk [vmem:[%s1915_s2 + $0x30] sm:$0xf] %vm1094_vm3, %v1306_v21  ;;  %v1309_v27 = vpack.c.bf16 %v789_v25, %v789_v25  ;;  %v821_v28 = vsel %vm693_vm0, %v1446_v9, %v757_v23  ;;  %vm691_vm2 = vcmp.gt.f32.partialorder %v570_v14, 0.0  ;;  %v755_v29 = vmul.f32 0.2, %v570_v14  ;;  %v455_v35 = vpop.f32.mrb[17].mxu0 }
 0x104   :  { %1139 = vst.msk [vmem:[%s1915_s2 + $0xb0] sm:$0xf] %vm1094_vm3, %v1338_v24  ;;  %v1341_v32 = vpack.c.bf16 %v821_v28, %v821_v28  ;;  %v787_v33 = vsel %vm659_vm1, %v442_v13, %v723_v26  ;;  %vm664_vm4 = vcmp.gt.f32.partialorder %v1417_v30, 0.0  ;;  %v728_v34 = vmul.f32 0.2, %v1417_v30  ;;  %v583_v36 = vpop.f32.mrb[17].mxu1 }
 0x105   :  { %1110 = vst.msk [vmem:[%s1915_s2 + $0x3c] sm:$0xf] %vm1094_vm3, %v1309_v27  ;;  %v1307_v37 = vpack.c.bf16 %v787_v33, %v787_v33  ;;  %v819_v38 = vsel %vm691_vm2, %v570_v14, %v755_v29  ;;  %vm696_vm5 = vcmp.gt.f32.partialorder %v1449_v31, 0.0  ;;  %v760_v39 = vmul.f32 0.2, %v1449_v31  ;;  %v1418_v40 = vpop.f32.mrb[18].mxu0 }
 0x106   :  { %v1450_v41 = vpop.f32.mrb[18].mxu1  ;;  %1142 = vst.msk [vmem:[%s1915_s2 + $0xbc] sm:$0xf] %vm1094_vm3, %v1341_v32  ;;  %v1339_v42 = vpack.c.bf16 %v819_v38, %v819_v38  ;;  %v792_v43 = vsel %vm664_vm4, %v1417_v30, %v728_v34  ;;  %vm662_vm6 = vcmp.gt.f32.partialorder %v455_v35, 0.0  ;;  %v726_v44 = vmul.f32 0.2, %v455_v35 }
 0x107   :  { %v458_v45 = vpop.f32.mrb[19].mxu0  ;;  %v586_v46 = vpop.f32.mrb[19].mxu1  ;;  %1108 = vst.msk [vmem:[%s1915_s2 + $0x34] sm:$0xf] %vm1094_vm3, %v1307_v37  ;;  %v1312_v47 = vpack.c.bf16 %v792_v43, %v792_v43  ;;  %v824_v48 = vsel %vm696_vm5, %v1449_v31, %v760_v39  ;;  %vm694_vm7 = vcmp.gt.f32.partialorder %v583_v36, 0.0  ;;  %vm665_vm8 = vcmp.gt.f32.partialorder %v1418_v40, 0.0 }
 0x108   :  { %v758_v49 = vmul.f32 0.2, %v583_v36  ;;  %1140 = vst.msk [vmem:[%s1915_s2 + $0xb4] sm:$0xf] %vm1094_vm3, %v1339_v42  ;;  %v1344_v50 = vpack.c.bf16 %v824_v48, %v824_v48  ;;  %v790_v51 = vsel %vm662_vm6, %v455_v35, %v726_v44  ;;  %v729_v52 = vmul.f32 0.2, %v1418_v40 }
 0x109   :  { %1113 = vst.msk [vmem:[%s1915_s2 + $0x48] sm:$0xf] %vm1094_vm3, %v1312_v47  ;;  %v1310_v53 = vpack.c.bf16 %v790_v51, %v790_v51  ;;  %vm697_vm9 = vcmp.gt.f32.partialorder %v1450_v41, 0.0  ;;  %v761_v55 = vmul.f32 0.2, %v1450_v41  ;;  %vm663_vm10 = vcmp.gt.f32.partialorder %v458_v45, 0.0 }
 0x10a   :  { %v822_v54 = vsel %vm694_vm7, %v583_v36, %v758_v49  ;;  %1145 = vst.msk [vmem:[%s1915_s2 + $0xc8] sm:$0xf] %vm1094_vm3, %v1344_v50  ;;  %v793_v57 = vsel %vm665_vm8, %v1418_v40, %v729_v52  ;;  %v727_v58 = vmul.f32 0.2, %v458_v45  ;;  %vm695_vm11 = vcmp.gt.f32.partialorder %v586_v46, 0.0  ;;  %v1421_v62 = vpop.f32.mrb[20].mxu0 }
 0x10b   :  { %v1342_v56 = vpack.c.bf16 %v822_v54, %v822_v54  ;;  %1111 = vst.msk [vmem:[%s1915_s2 + $0x40] sm:$0xf] %vm1094_vm3, %v1310_v53  ;;  %v1313_v59 = vpack.c.bf16 %v793_v57, %v793_v57  ;;  %v825_v60 = vsel %vm697_vm9, %v1450_v41, %v761_v55  ;;  %v759_v61 = vmul.f32 0.2, %v586_v46  ;;  %v1453_v63 = vpop.f32.mrb[20].mxu1  ;;  %v471_v3 = vpop.f32.mrb[21].mxu0 }
 0x10c   :  { %v1345_v0 = vpack.c.bf16 %v825_v60, %v825_v60  ;;  %v791_v1 = vsel %vm663_vm10, %v458_v45, %v727_v58  ;;  %vm668_vm12 = vcmp.gt.f32.partialorder %v1421_v62, 0.0  ;;  %v732_v2 = vmul.f32 0.2, %v1421_v62  ;;  %v599_v4 = vpop.f32.mrb[21].mxu1  ;;  %v1422_v8 = vpop.f32.mrb[22].mxu0 }
 0x10d   :  { %1143 = vst.msk [vmem:[%s1915_s2 + $0xc0] sm:$0xf] %vm1094_vm3, %v1342_v56  ;;  %1114 = vst.msk [vmem:[%s1915_s2 + $0x4c] sm:$0xf] %vm1094_vm3, %v1313_v59  ;;  %v1311_v5 = vpack.c.bf16 %v791_v1, %v791_v1  ;;  %v823_v6 = vsel %vm695_vm11, %v586_v46, %v759_v61  ;;  %vm700_vm13 = vcmp.gt.f32.partialorder %v1453_v63, 0.0  ;;  %v1454_v9 = vpop.f32.mrb[22].mxu1 }
 0x10e   :  { %v764_v7 = vmul.f32 0.2, %v1453_v63  ;;  %1146 = vst.msk [vmem:[%s1915_s2 + $0xcc] sm:$0xf] %vm1094_vm3, %v1345_v0  ;;  %v1343_v10 = vpack.c.bf16 %v823_v6, %v823_v6  ;;  %v796_v11 = vsel %vm668_vm12, %v1421_v62, %v732_v2  ;;  %vm666_vm14 = vcmp.gt.f32.partialorder %v471_v3, 0.0  ;;  %v474_v13 = vpop.f32.mrb[23].mxu0 }
 0x10f   :  { %v730_v12 = vmul.f32 0.2, %v471_v3  ;;  %v602_v14 = vpop.f32.mrb[23].mxu1  ;;  %1112 = vst.msk [vmem:[%s1915_s2 + $0x44] sm:$0xf] %vm1094_vm3, %v1311_v5  ;;  %v1316_v15 = vpack.c.bf16 %v796_v11, %v796_v11  ;;  %vm698_vm15 = vcmp.gt.f32.partialorder %v599_v4, 0.0 }
 0x110   :  { %v828_v16 = vsel %vm700_vm13, %v1453_v63, %v764_v7  ;;  %v762_v17 = vmul.f32 0.2, %v599_v4  ;;  %1144 = vst.msk [vmem:[%s1915_s2 + $0xc4] sm:$0xf] %vm1094_vm3, %v1343_v10  ;;  %vm669_vm0 = vcmp.gt.f32.partialorder %v1422_v8, 0.0  ;;  %vm701_vm1 = vcmp.gt.f32.partialorder %v1454_v9, 0.0 }
 0x111   :  { %v1348_v18 = vpack.c.bf16 %v828_v16, %v828_v16  ;;  %v794_v19 = vsel %vm666_vm14, %v471_v3, %v730_v12  ;;  %v733_v20 = vmul.f32 0.2, %v1422_v8  ;;  %1117 = vst.msk [vmem:[%s1915_s2 + $0x58] sm:$0xf] %vm1094_vm3, %v1316_v15  ;;  %v765_v23 = vmul.f32 0.2, %v1454_v9 }
 0x112   :  { %v1314_v21 = vpack.c.bf16 %v794_v19, %v794_v19  ;;  %v826_v22 = vsel %vm698_vm15, %v599_v4, %v762_v17  ;;  %vm667_vm2 = vcmp.gt.f32.partialorder %v474_v13, 0.0  ;;  %v731_v26 = vmul.f32 0.2, %v474_v13  ;;  %v1425_v30 = vpop.f32.mrb[24].mxu0  ;;  %v1457_v31 = vpop.f32.mrb[24].mxu1 }
 0x113   :  { %1149 = vst.msk [vmem:[%s1915_s2 + $0xd8] sm:$0xf] %vm1094_vm3, %v1348_v18  ;;  %v1346_v24 = vpack.c.bf16 %v826_v22, %v826_v22  ;;  %v797_v25 = vsel %vm669_vm0, %v1422_v8, %v733_v20  ;;  %v829_v28 = vsel %vm701_vm1, %v1454_v9, %v765_v23  ;;  %vm699_vm4 = vcmp.gt.f32.partialorder %v602_v14, 0.0  ;;  %v487_v35 = vpop.f32.mrb[25].mxu0  ;;  %v615_v36 = vpop.f32.mrb[25].mxu1 }
 0x114   :  { %1115 = vst.msk [vmem:[%s1915_s2 + $0x50] sm:$0xf] %vm1094_vm3, %v1314_v21  ;;  %v1317_v27 = vpack.c.bf16 %v797_v25, %v797_v25  ;;  %v763_v29 = vmul.f32 0.2, %v602_v14  ;;  %v1349_v32 = vpack.c.bf16 %v829_v28, %v829_v28  ;;  %v795_v33 = vsel %vm667_vm2, %v474_v13, %v731_v26  ;;  %v1426_v40 = vpop.f32.mrb[26].mxu0  ;;  %v1458_v41 = vpop.f32.mrb[26].mxu1 }
 0x115   :  { %1147 = vst.msk [vmem:[%s1915_s2 + $0xd0] sm:$0xf] %vm1094_vm3, %v1346_v24  ;;  %vm672_vm5 = vcmp.gt.f32.partialorder %v1425_v30, 0.0  ;;  %v736_v34 = vmul.f32 0.2, %v1425_v30  ;;  %v1315_v37 = vpack.c.bf16 %v795_v33, %v795_v33  ;;  %vm704_vm6 = vcmp.gt.f32.partialorder %v1457_v31, 0.0 }
 0x116   :  { %1118 = vst.msk [vmem:[%s1915_s2 + $0x5c] sm:$0xf] %vm1094_vm3, %v1317_v27  ;;  %v827_v38 = vsel %vm699_vm4, %v602_v14, %v763_v29  ;;  %v768_v39 = vmul.f32 0.2, %v1457_v31  ;;  %1150 = vst.msk [vmem:[%s1915_s2 + $0xdc] sm:$0xf] %vm1094_vm3, %v1349_v32 }
 0x117   :  { %v1347_v42 = vpack.c.bf16 %v827_v38, %v827_v38  ;;  %v800_v43 = vsel %vm672_vm5, %v1425_v30, %v736_v34  ;;  %vm670_vm7 = vcmp.gt.f32.partialorder %v487_v35, 0.0  ;;  %v734_v44 = vmul.f32 0.2, %v487_v35  ;;  %v490_v45 = vpop.f32.mrb[27].mxu0  ;;  %v618_v46 = vpop.f32.mrb[27].mxu1 }
 0x118   :  { %1116 = vst.msk [vmem:[%s1915_s2 + $0x54] sm:$0xf] %vm1094_vm3, %v1315_v37  ;;  %v1320_v47 = vpack.c.bf16 %v800_v43, %v800_v43  ;;  %v832_v48 = vsel %vm704_vm6, %v1457_v31, %v768_v39  ;;  %vm702_vm8 = vcmp.gt.f32.partialorder %v615_v36, 0.0  ;;  %v766_v49 = vmul.f32 0.2, %v615_v36 }
 0x119   :  { %1148 = vst.msk [vmem:[%s1915_s2 + $0xd4] sm:$0xf] %vm1094_vm3, %v1347_v42  ;;  %v1352_v50 = vpack.c.bf16 %v832_v48, %v832_v48  ;;  %v798_v51 = vsel %vm670_vm7, %v487_v35, %v734_v44  ;;  %vm673_vm9 = vcmp.gt.f32.partialorder %v1426_v40, 0.0  ;;  %v737_v52 = vmul.f32 0.2, %v1426_v40  ;;  %v1429_v62 = vpop.f32.mrb[28].mxu0 }
 0x11a   :  { %1121 = vst.msk [vmem:[%s1915_s2 + $0x68] sm:$0xf] %vm1094_vm3, %v1320_v47  ;;  %v1318_v53 = vpack.c.bf16 %v798_v51, %v798_v51  ;;  %v830_v54 = vsel %vm702_vm8, %v615_v36, %v766_v49  ;;  %vm705_vm10 = vcmp.gt.f32.partialorder %v1458_v41, 0.0  ;;  %v769_v55 = vmul.f32 0.2, %v1458_v41  ;;  %v1461_v63 = vpop.f32.mrb[28].mxu1 }
 0x11b   :  { %1153 = vst.msk [vmem:[%s1915_s2 + $0xe8] sm:$0xf] %vm1094_vm3, %v1352_v50  ;;  %v1350_v56 = vpack.c.bf16 %v830_v54, %v830_v54  ;;  %v801_v57 = vsel %vm673_vm9, %v1426_v40, %v737_v52  ;;  %vm671_vm11 = vcmp.gt.f32.partialorder %v490_v45, 0.0  ;;  %v735_v58 = vmul.f32 0.2, %v490_v45  ;;  %v503_v3 = vpop.f32.mrb[29].mxu0 }
 0x11c   :  { %1119 = vst.msk [vmem:[%s1915_s2 + $0x60] sm:$0xf] %vm1094_vm3, %v1318_v53  ;;  %v1321_v59 = vpack.c.bf16 %v801_v57, %v801_v57  ;;  %v833_v60 = vsel %vm705_vm10, %v1458_v41, %v769_v55  ;;  %vm703_vm12 = vcmp.gt.f32.partialorder %v618_v46, 0.0  ;;  %v767_v61 = vmul.f32 0.2, %v618_v46  ;;  %v631_v4 = vpop.f32.mrb[29].mxu1 }
 0x11d   :  { %1151 = vst.msk [vmem:[%s1915_s2 + $0xe0] sm:$0xf] %vm1094_vm3, %v1350_v56  ;;  %v1353_v0 = vpack.c.bf16 %v833_v60, %v833_v60  ;;  %v799_v1 = vsel %vm671_vm11, %v490_v45, %v735_v58  ;;  %vm676_vm13 = vcmp.gt.f32.partialorder %v1429_v62, 0.0  ;;  %v740_v2 = vmul.f32 0.2, %v1429_v62  ;;  %v1430_v8 = vpop.f32.mrb[30].mxu0 }
 0x11e   :  { %1122 = vst.msk [vmem:[%s1915_s2 + $0x6c] sm:$0xf] %vm1094_vm3, %v1321_v59  ;;  %v1319_v5 = vpack.c.bf16 %v799_v1, %v799_v1  ;;  %v831_v6 = vsel %vm703_vm12, %v618_v46, %v767_v61  ;;  %vm708_vm14 = vcmp.gt.f32.partialorder %v1461_v63, 0.0  ;;  %v772_v7 = vmul.f32 0.2, %v1461_v63  ;;  %v1462_v9 = vpop.f32.mrb[30].mxu1 }
 0x11f   :  { %1154 = vst.msk [vmem:[%s1915_s2 + $0xec] sm:$0xf] %vm1094_vm3, %v1353_v0  ;;  %v1351_v10 = vpack.c.bf16 %v831_v6, %v831_v6  ;;  %v804_v11 = vsel %vm676_vm13, %v1429_v62, %v740_v2  ;;  %vm674_vm15 = vcmp.gt.f32.partialorder %v503_v3, 0.0  ;;  %v738_v12 = vmul.f32 0.2, %v503_v3  ;;  %v506_v13 = vpop.f32.mrb[31].mxu0 }
 0x120   :  { %v634_v14 = vpop.f32.mrb[31].mxu1  ;;  %1120 = vst.msk [vmem:[%s1915_s2 + $0x64] sm:$0xf] %vm1094_vm3, %v1319_v5  ;;  %v1324_v15 = vpack.c.bf16 %v804_v11, %v804_v11  ;;  %v836_v16 = vsel %vm708_vm14, %v1461_v63, %v772_v7  ;;  %vm706_vm0 = vcmp.gt.f32.partialorder %v631_v4, 0.0  ;;  %v770_v17 = vmul.f32 0.2, %v631_v4 }
 0x121   :  { %1152 = vst.msk [vmem:[%s1915_s2 + $0xe4] sm:$0xf] %vm1094_vm3, %v1351_v10  ;;  %v1356_v18 = vpack.c.bf16 %v836_v16, %v836_v16  ;;  %v802_v19 = vsel %vm674_vm15, %v503_v3, %v738_v12  ;;  %vm677_vm1 = vcmp.gt.f32.partialorder %v1430_v8, 0.0  ;;  %v741_v20 = vmul.f32 0.2, %v1430_v8 }
 0x122   :  { %1125 = vst.msk [vmem:[%s1915_s2 + $0x78] sm:$0xf] %vm1094_vm3, %v1324_v15  ;;  %v1322_v21 = vpack.c.bf16 %v802_v19, %v802_v19  ;;  %v834_v22 = vsel %vm706_vm0, %v631_v4, %v770_v17  ;;  %vm709_vm2 = vcmp.gt.f32.partialorder %v1462_v9, 0.0  ;;  %v773_v23 = vmul.f32 0.2, %v1462_v9 }
 0x123   :  { %1157 = vst.msk [vmem:[%s1915_s2 + $0xf8] sm:$0xf] %vm1094_vm3, %v1356_v18  ;;  %v1354_v24 = vpack.c.bf16 %v834_v22, %v834_v22  ;;  %v805_v25 = vsel %vm677_vm1, %v1430_v8, %v741_v20  ;;  %vm675_vm4 = vcmp.gt.f32.partialorder %v506_v13, 0.0  ;;  %v739_v26 = vmul.f32 0.2, %v506_v13 }
 0x124   :  { %1123 = vst.msk [vmem:[%s1915_s2 + $0x70] sm:$0xf] %vm1094_vm3, %v1322_v21  ;;  %v1325_v27 = vpack.c.bf16 %v805_v25, %v805_v25  ;;  %v837_v28 = vsel %vm709_vm2, %v1462_v9, %v773_v23  ;;  %vm707_vm5 = vcmp.gt.f32.partialorder %v634_v14, 0.0  ;;  %v771_v29 = vmul.f32 0.2, %v634_v14 }
 0x125   :  { %1155 = vst.msk [vmem:[%s1915_s2 + $0xf0] sm:$0xf] %vm1094_vm3, %v1354_v24  ;;  %v1357_v30 = vpack.c.bf16 %v837_v28, %v837_v28  ;;  %v803_v31 = vsel %vm675_vm4, %v506_v13, %v739_v26 }
 0x126   :  { %1126 = vst.msk [vmem:[%s1915_s2 + $0x7c] sm:$0xf] %vm1094_vm3, %v1325_v27  ;;  %v1323_v32 = vpack.c.bf16 %v803_v31, %v803_v31  ;;  %v835_v33 = vsel %vm707_vm5, %v634_v14, %v771_v29 }
 0x127   :  { %1158 = vst.msk [vmem:[%s1915_s2 + $0xfc] sm:$0xf] %vm1094_vm3, %v1357_v30  ;;  %v1355_v34 = vpack.c.bf16 %v835_v33, %v835_v33 }
 0x128   :  { %1124 = vst.msk [vmem:[%s1915_s2 + $0x74] sm:$0xf] %vm1094_vm3, %v1323_v32 }
 0x129   :  { %1156 = vst.msk [vmem:[%s1915_s2 + $0xf4] sm:$0xf] %vm1094_vm3, %v1355_v34 }

// kernel: _lambda_.4
= control target key start
LH: loop header
LB: loop body
LE: loop exit
PB: predicated region body
PF: predicated region fallthrough
CT: control target
= control target key end

     0   :  { %vm400_vm0 = vcmask 257024   ;;  %vm417_vm1 = vcmask 261120   ;;  %vm455_vm2 = vcmask 253952   ;;  %s965_s1 = inlined_call_operand.vmem [shape: bf16[256,32], index: 1, kind: input, shape index: {}]   ;;  %s966_s0 = inlined_call_operand.vmem [shape: bf16[128,256], index: 0, kind: input, shape index: {}]   ;;  %s967_s2 = inlined_call_operand.vmem [shape: bf16[128,32], index: 2, kind: output, shape index: {0}]   ;;  %s968_s3 = inlined_call_operand.vmem [shape: f32[1,1,32], index: 3, kind: output, shape index: {1}]   ;;  %s969_s4 = inlined_call_operand.vmem [shape: f32[1,1,32], index: 4, kind: output, shape index: {2}]  }
   0x1   :  { %v667_v0 = vld [vmem:[%s965_s1 + $0x40] sm:$0xff]   ;;  %v669_v2 = vld [vmem:[%s965_s1 + $0x48] sm:$0xff]   ;;  %v671_v4 = vld [vmem:[%s965_s1 + $0x50] sm:$0xff]  }
   0x2   :  { %v668_v1 = vld [vmem:[%s965_s1] sm:$0xff]   ;;  %587 = vmatprep.subr.bf16.mxu0 %v667_v0  ;;  %651 = vmatprep.subr.bf16.mxu1 %v667_v0  ;;  %v670_v3 = vld [vmem:[%s965_s1 + $0x8] sm:$0xff]   ;;  %v672_v5 = vld [vmem:[%s965_s1 + $0x10] sm:$0xff]  }
   0x3   :  { %588 = vmatpush3.bf16.msra.mxu0 %v668_v1  ;;  %659 = vmatpush3.bf16.msra.mxu1 %v668_v1  ;;  %v673_v6 = vld [vmem:[%s965_s1 + $0x58] sm:$0xff]   ;;  %v675_v8 = vld [vmem:[%s965_s1 + $0x60] sm:$0xff]   ;;  %v677_v10 = vld [vmem:[%s965_s1 + $0x68] sm:$0xff]  }
   0x4   :  { %589 = vmatprep.subr.bf16.mxu0 %v669_v2  ;;  %652 = vmatprep.subr.bf16.mxu1 %v669_v2  ;;  %v674_v7 = vld [vmem:[%s965_s1 + $0x18] sm:$0xff]   ;;  %v676_v9 = vld [vmem:[%s965_s1 + $0x20] sm:$0xff]   ;;  %v678_v12 = vld [vmem:[%s965_s1 + $0x28] sm:$0xff]  }
   0x5   :  { %v685_v11 = vld [vmem:[%s966_s0 + $0x4] ss:$8 sps:$4 sm:$0xff]   ;;  %v679_v14 = vld [vmem:[%s965_s1 + $0x70] sm:$0xff]   ;;  %v681_v16 = vld [vmem:[%s965_s1 + $0x78] sm:$0xff]  }
   0x6   :  { %v691_v13 = vld [vmem:[%s966_s0 + $0x44] ss:$8 sps:$4 sm:$0xff]   ;;  %271 = vmatprep.mubr.bf16.mxu0 %v685_v11  ;;  %v680_v15 = vld [vmem:[%s965_s1 + $0x30] sm:$0xff]   ;;  %v682_v17 = vld [vmem:[%s965_s1 + $0x38] sm:$0xff]  }
   0x7   :  { %590 = vmatpush3.bf16.msra.mxu0 %v670_v3  ;;  %660 = vmatpush3.bf16.msra.mxu1 %v670_v3  ;;  %v683_v18 = vld [vmem:[%s966_s0] ss:$8 sps:$4 sm:$0xff]   ;;  %v686_v20 = vld [vmem:[%s966_s0 + $0x14] ss:$8 sps:$4 sm:$0xff]   ;;  %v688_v22 = vld [vmem:[%s966_s0 + $0x10] ss:$8 sps:$4 sm:$0xff]  }
   0x8   :  { %591 = vmatprep.subr.bf16.mxu0 %v671_v4  ;;  %653 = vmatprep.subr.bf16.mxu1 %v671_v4  ;;  %v689_v19 = vld [vmem:[%s966_s0 + $0x40] ss:$8 sps:$4 sm:$0xff]   ;;  %v695_v21 = vld [vmem:[%s966_s0 + $0x54] ss:$8 sps:$4 sm:$0xff]   ;;  %v697_v23 = vld [vmem:[%s966_s0 + $0x50] ss:$8 sps:$4 sm:$0xff]  }
   0x9   :  { %303 = vmatprep.mubr.bf16.mxu1 %v691_v13  ;;  %v692_v24 = vld [vmem:[%s966_s0 + $0x24] ss:$8 sps:$4 sm:$0xff]   ;;  %v694_v26 = vld [vmem:[%s966_s0 + $0x20] ss:$8 sps:$4 sm:$0xff]   ;;  %v698_v28 = vld [vmem:[%s966_s0 + $0x34] ss:$8 sps:$4 sm:$0xff]  }
   0xa   :  { %v701_v25 = vld [vmem:[%s966_s0 + $0x64] ss:$8 sps:$4 sm:$0xff]   ;;  %v703_v27 = vld [vmem:[%s966_s0 + $0x60] ss:$8 sps:$4 sm:$0xff]   ;;  %v704_v29 = vld [vmem:[%s966_s0 + $0x74] ss:$8 sps:$4 sm:$0xff]  }
   0xb   :  { %592 = vmatpush3.bf16.msra.mxu0 %v672_v5  ;;  %661 = vmatpush3.bf16.msra.mxu1 %v672_v5  ;;  %v700_v30 = vld [vmem:[%s966_s0 + $0x30] ss:$8 sps:$4 sm:$0xff]  }
   0xc   :  { %593 = vmatprep.subr.bf16.mxu0 %v673_v6  ;;  %654 = vmatprep.subr.bf16.mxu1 %v673_v6  ;;  %v706_v31 = vld [vmem:[%s966_s0 + $0x70] ss:$8 sps:$4 sm:$0xff]  }
   0xf   :  { %594 = vmatpush3.bf16.msra.mxu0 %v674_v7  ;;  %662 = vmatpush3.bf16.msra.mxu1 %v674_v7 }
  0x10   :  { %595 = vmatprep.subr.bf16.mxu0 %v675_v8  ;;  %655 = vmatprep.subr.bf16.mxu1 %v675_v8 }
  0x13   :  { %596 = vmatpush3.bf16.msra.mxu0 %v676_v9  ;;  %663 = vmatpush3.bf16.msra.mxu1 %v676_v9 }
  0x14   :  { %597 = vmatprep.subr.bf16.mxu0 %v677_v10  ;;  %656 = vmatprep.subr.bf16.mxu1 %v677_v10 }
  0x17   :  { %598 = vmatpush3.bf16.msra.mxu0 %v678_v12  ;;  %664 = vmatpush3.bf16.msra.mxu1 %v678_v12 }
  0x18   :  { %599 = vmatprep.subr.bf16.mxu0 %v679_v14  ;;  %657 = vmatprep.subr.bf16.mxu1 %v679_v14 }
  0x1b   :  { %600 = vmatpush3.bf16.msra.mxu0 %v680_v15  ;;  %665 = vmatpush3.bf16.msra.mxu1 %v680_v15 }
  0x1c   :  { %601 = vmatprep.subr.bf16.mxu0 %v681_v16  ;;  %658 = vmatprep.subr.bf16.mxu1 %v681_v16 }
  0x1f   :  { %602 = vmatpush3.bf16.msra.mxu0 %v682_v17  ;;  %666 = vmatpush3.bf16.msra.mxu1 %v682_v17 }
  0x22   :  { %272 = vmatmul.mubr.bf16.vlgmr.msra.gmra.mrb[0].mxu0 %v683_v18  ;;  %304 = vmatmul.mubr.bf16.vlgmr.msra.gmra.mrb[0].mxu1 %v689_v19 }
  0x23   :  { %279 = vmatprep.mubr.bf16.mxu0 %v686_v20  ;;  %311 = vmatprep.mubr.bf16.mxu1 %v695_v21 }
  0x2a   :  { %280 = vmatmul.mubr.bf16.gmra.mrb[4].mxu0 %v688_v22  ;;  %312 = vmatmul.mubr.bf16.gmra.mrb[4].mxu1 %v697_v23 }
  0x2b   :  { %287 = vmatprep.mubr.bf16.mxu0 %v692_v24  ;;  %319 = vmatprep.mubr.bf16.mxu1 %v701_v25 }
  0x32   :  { %288 = vmatmul.mubr.bf16.gmra.mrb[8].mxu0 %v694_v26  ;;  %320 = vmatmul.mubr.bf16.gmra.mrb[8].mxu1 %v703_v27 }
  0x33   :  { %295 = vmatprep.mubr.bf16.mxu0 %v698_v28  ;;  %327 = vmatprep.mubr.bf16.mxu1 %v704_v29 }
  0x3a   :  { %296 = vmatmul.mubr.bf16.gmra.mrb[12].mxu0 %v700_v30  ;;  %328 = vmatmul.mubr.bf16.gmra.mrb[12].mxu1 %v706_v31 }
  0xf5   :  { %v603_v32 = vpop.f32.mrb[0].mxu0  ;;  %v627_v33 = vpop.f32.mrb[0].mxu1 }
  0xf6   :  { %v604_v34 = vpop.f32.mrb[1].mxu0  ;;  %v628_v35 = vpop.f32.mrb[1].mxu1 }
  0xf7   :  { %v605_v36 = vadd.f32 %v604_v34, %v603_v32  ;;  %v606_v37 = vpop.f32.mrb[2].mxu0  ;;  %v828_v38 = vadd.f32 %v628_v35, %v627_v33  ;;  %v630_v39 = vpop.f32.mrb[2].mxu1 }
  0xf8   :  { %v607_v40 = vpop.f32.mrb[3].mxu0  ;;  %v631_v41 = vpop.f32.mrb[3].mxu1 }
  0xf9   :  { %v571_v42 = vpack.c.bf16 %v605_v36, %v605_v36  ;;  %v457_v43 = vmul.f32 %v605_v36, %v605_v36  ;;  %v608_v44 = vadd.f32 %v607_v40, %v606_v37  ;;  %v579_v45 = vpack.c.bf16 %v828_v38, %v828_v38 }
  0xfa   :  { %v832_v46 = vadd.f32 %v631_v41, %v630_v39  ;;  %v418_v47 = vsel %vm417_vm1, %v605_v36, 0.0 }
  0xfb   :  { %401 = vst.msk [vmem:[%s967_s2] sm:$0xf] %vm400_vm0, %v571_v42  ;;  %v572_v48 = vpack.c.bf16 %v608_v44, %v608_v44  ;;  %v419_v49 = vsel %vm417_vm1, %v608_v44, 0.0  ;;  %v458_v50 = vmul.f32 %v608_v44, %v608_v44  ;;  %409 = vst.msk [vmem:[%s967_s2 + $0x20] sm:$0xf] %vm400_vm0, %v579_v45  ;;  %v473_v53 = vsel %vm417_vm1, %v457_v43, 0.0 }
  0xfc   :  { %v420_v51 = vadd.f32 %v419_v49, %v418_v47  ;;  %v580_v52 = vpack.c.bf16 %v832_v46, %v832_v46 }
  0xfd   :  { %402 = vst.msk [vmem:[%s967_s2 + $0x4] sm:$0xf] %vm400_vm0, %v572_v48  ;;  %v474_v54 = vsel %vm417_vm1, %v458_v50, 0.0  ;;  %v609_v55 = vpop.f32.mrb[4].mxu0  ;;  %v633_v56 = vpop.f32.mrb[4].mxu1 }
  0xfe   :  { %v475_v57 = vadd.f32 %v474_v54, %v473_v53  ;;  %v610_v58 = vpop.f32.mrb[5].mxu0  ;;  %410 = vst.msk [vmem:[%s967_s2 + $0x24] sm:$0xf] %vm400_vm0, %v580_v52  ;;  %v634_v59 = vpop.f32.mrb[5].mxu1 }
  0xff   :  { %v611_v60 = vadd.f32 %v610_v58, %v609_v55  ;;  %v612_v61 = vpop.f32.mrb[6].mxu0  ;;  %v856_v62 = vadd.f32 %v634_v59, %v633_v56  ;;  %v636_v63 = vpop.f32.mrb[6].mxu1 }
 0x100   :  { %v613_v0 = vpop.f32.mrb[7].mxu0  ;;  %v637_v1 = vpop.f32.mrb[7].mxu1 }
 0x101   :  { %v573_v2 = vpack.c.bf16 %v611_v60, %v611_v60  ;;  %v421_v3 = vsel %vm417_vm1, %v611_v60, 0.0  ;;  %v459_v4 = vmul.f32 %v611_v60, %v611_v60  ;;  %v614_v5 = vadd.f32 %v613_v0, %v612_v61 }
 0x102   :  { %v422_v6 = vadd.f32 %v421_v3, %v420_v51  ;;  %v581_v7 = vpack.c.bf16 %v856_v62, %v856_v62  ;;  %v871_v14 = vadd.f32 %v637_v1, %v636_v63  ;;  %v465_v60 = vmul.f32 %v828_v38, %v828_v38 }
 0x103   :  { %403 = vst.msk [vmem:[%s967_s2 + $0x8] sm:$0xf] %vm400_vm0, %v573_v2  ;;  %v476_v8 = vsel %vm417_vm1, %v459_v4, 0.0  ;;  %v574_v9 = vpack.c.bf16 %v614_v5, %v614_v5  ;;  %v423_v10 = vsel %vm417_vm1, %v614_v5, 0.0  ;;  %v460_v11 = vmul.f32 %v614_v5, %v614_v5 }
 0x104   :  { %v477_v12 = vadd.f32 %v476_v8, %v475_v57  ;;  %v424_v13 = vadd.f32 %v423_v10, %v422_v6  ;;  %411 = vst.msk [vmem:[%s967_s2 + $0x28] sm:$0xf] %vm400_vm0, %v581_v7  ;;  %v582_v20 = vpack.c.bf16 %v871_v14, %v871_v14  ;;  %v433_v7 = vsel %vm417_vm1, %v828_v38, 0.0 }
 0x105   :  { %404 = vst.msk [vmem:[%s967_s2 + $0xc] sm:$0xf] %vm400_vm0, %v574_v9  ;;  %v478_v15 = vsel %vm417_vm1, %v460_v11, 0.0  ;;  %v615_v16 = vpop.f32.mrb[8].mxu0  ;;  %v639_v17 = vpop.f32.mrb[8].mxu1  ;;  %v466_v8 = vmul.f32 %v832_v46, %v832_v46  ;;  %v467_v38 = vmul.f32 %v856_v62, %v856_v62 }
 0x106   :  { %v479_v18 = vadd.f32 %v478_v15, %v477_v12  ;;  %v616_v19 = vpop.f32.mrb[9].mxu0  ;;  %v640_v21 = vpop.f32.mrb[9].mxu1  ;;  %412 = vst.msk [vmem:[%s967_s2 + $0x2c] sm:$0xf] %vm400_vm0, %v582_v20  ;;  %v435_v15 = vsel %vm417_vm1, %v832_v46, 0.0  ;;  %v468_v20 = vmul.f32 %v871_v14, %v871_v14 }
 0x107   :  { %v617_v22 = vadd.f32 %v616_v19, %v615_v16  ;;  %v618_v23 = vpop.f32.mrb[10].mxu0  ;;  %v880_v24 = vadd.f32 %v640_v21, %v639_v17  ;;  %v642_v25 = vpop.f32.mrb[10].mxu1  ;;  %v437_v19 = vsel %vm417_vm1, %v856_v62, 0.0 }
 0x108   :  { %v619_v26 = vpop.f32.mrb[11].mxu0  ;;  %v643_v27 = vpop.f32.mrb[11].mxu1 }
 0x109   :  { %v575_v28 = vpack.c.bf16 %v617_v22, %v617_v22  ;;  %v425_v29 = vsel %vm417_vm1, %v617_v22, 0.0  ;;  %v461_v30 = vmul.f32 %v617_v22, %v617_v22  ;;  %v620_v31 = vadd.f32 %v619_v26, %v618_v23 }
 0x10a   :  { %v426_v32 = vadd.f32 %v425_v29, %v424_v13  ;;  %v583_v33 = vpack.c.bf16 %v880_v24, %v880_v24  ;;  %v644_v41 = vadd.f32 %v643_v27, %v642_v25  ;;  %v488_v13 = vsel %vm417_vm1, %v465_v60, 0.0 }
 0x10b   :  { %405 = vst.msk [vmem:[%s967_s2 + $0x10] sm:$0xf] %vm400_vm0, %v575_v28  ;;  %v480_v34 = vsel %vm417_vm1, %v461_v30, 0.0  ;;  %v576_v35 = vpack.c.bf16 %v620_v31, %v620_v31  ;;  %v427_v36 = vsel %vm417_vm1, %v620_v31, 0.0  ;;  %v462_v37 = vmul.f32 %v620_v31, %v620_v31 }
 0x10c   :  { %v481_v39 = vadd.f32 %v480_v34, %v479_v18  ;;  %v428_v40 = vadd.f32 %v427_v36, %v426_v32  ;;  %413 = vst.msk [vmem:[%s967_s2 + $0x30] sm:$0xf] %vm400_vm0, %v583_v33  ;;  %v584_v48 = vpack.c.bf16 %v644_v41, %v644_v41  ;;  %v490_v18 = vsel %vm417_vm1, %v466_v8, 0.0 }
 0x10d   :  { %406 = vst.msk [vmem:[%s967_s2 + $0x14] sm:$0xf] %vm400_vm0, %v576_v35  ;;  %v482_v42 = vsel %vm417_vm1, %v462_v37, 0.0  ;;  %v621_v43 = vpop.f32.mrb[12].mxu0  ;;  %v645_v44 = vpop.f32.mrb[12].mxu1  ;;  %v492_v22 = vsel %vm417_vm1, %v467_v38, 0.0  ;;  %v469_v25 = vmul.f32 %v880_v24, %v880_v24  ;;  %v470_v29 = vmul.f32 %v644_v41, %v644_v41 }
 0x10e   :  { %v483_v45 = vadd.f32 %v482_v42, %v481_v39  ;;  %v622_v47 = vpop.f32.mrb[13].mxu0  ;;  %v646_v49 = vpop.f32.mrb[13].mxu1  ;;  %414 = vst.msk [vmem:[%s967_s2 + $0x34] sm:$0xf] %vm400_vm0, %v584_v48  ;;  %v439_v23 = vsel %vm417_vm1, %v871_v14, 0.0  ;;  %v494_v28 = vsel %vm417_vm1, %v468_v20, 0.0 }
 0x10f   :  { %v623_v50 = vadd.f32 %v622_v47, %v621_v43  ;;  %v624_v51 = vpop.f32.mrb[14].mxu0  ;;  %v647_v52 = vadd.f32 %v646_v49, %v645_v44  ;;  %v648_v53 = vpop.f32.mrb[14].mxu1  ;;  %v441_v62 = vsel %vm417_vm1, %v880_v24, 0.0  ;;  %v496_v33 = vsel %vm417_vm1, %v469_v25, 0.0 }
 0x110   :  { %v625_v54 = vpop.f32.mrb[15].mxu0  ;;  %v649_v55 = vpop.f32.mrb[15].mxu1  ;;  %v443_v34 = vsel %vm417_vm1, %v644_v41, 0.0  ;;  %v498_v37 = vsel %vm417_vm1, %v470_v29, 0.0 }
 0x111   :  { %v577_v56 = vpack.c.bf16 %v623_v50, %v623_v50  ;;  %v429_v57 = vsel %vm417_vm1, %v623_v50, 0.0  ;;  %v463_v58 = vmul.f32 %v623_v50, %v623_v50  ;;  %v626_v59 = vadd.f32 %v625_v54, %v624_v51 }
 0x112   :  { %v430_v61 = vadd.f32 %v429_v57, %v428_v40  ;;  %v585_v63 = vpack.c.bf16 %v647_v52, %v647_v52  ;;  %v650_v6 = vadd.f32 %v649_v55, %v648_v53  ;;  %v471_v30 = vmul.f32 %v647_v52, %v647_v52 }
 0x113   :  { %407 = vst.msk [vmem:[%s967_s2 + $0x18] sm:$0xf] %vm400_vm0, %v577_v56  ;;  %v484_v0 = vsel %vm417_vm1, %v463_v58, 0.0  ;;  %v578_v1 = vpack.c.bf16 %v626_v59, %v626_v59  ;;  %v431_v2 = vsel %vm417_vm1, %v626_v59, 0.0  ;;  %v464_v3 = vmul.f32 %v626_v59, %v626_v59 }
 0x114   :  { %v485_v4 = vadd.f32 %v484_v0, %v483_v45  ;;  %v432_v5 = vadd.f32 %v431_v2, %v430_v61  ;;  %415 = vst.msk [vmem:[%s967_s2 + $0x38] sm:$0xf] %vm400_vm0, %v585_v63  ;;  %v586_v12 = vpack.c.bf16 %v650_v6, %v650_v6  ;;  %v445_v14 = vsel %vm417_vm1, %v647_v52, 0.0 }
 0x115   :  { %408 = vst.msk [vmem:[%s967_s2 + $0x1c] sm:$0xf] %vm400_vm0, %v578_v1  ;;  %v486_v9 = vsel %vm417_vm1, %v464_v3, 0.0  ;;  %v500_v39 = vsel %vm417_vm1, %v471_v30, 0.0  ;;  %v472_v40 = vmul.f32 %v650_v6, %v650_v6  ;;  %v447_v24 = vsel %vm417_vm1, %v650_v6, 0.0 }
 0x116   :  { %v434_v10 = vadd.f32 %v433_v7, %v432_v5  ;;  %v487_v11 = vadd.f32 %v486_v9, %v485_v4  ;;  %416 = vst.msk [vmem:[%s967_s2 + $0x3c] sm:$0xf] %vm400_vm0, %v586_v12 }
 0x117   :  { %v502_v47 = vsel %vm417_vm1, %v472_v40, 0.0 }
 0x118   :  { %v436_v16 = vadd.f32 %v435_v15, %v434_v10  ;;  %v489_v17 = vadd.f32 %v488_v13, %v487_v11 }
 0x11a   :  { %v491_v21 = vadd.f32 %v490_v18, %v489_v17  ;;  %v438_v46 = vadd.f32 %v437_v19, %v436_v16 }
 0x11c   :  { %v440_v26 = vadd.f32 %v439_v23, %v438_v46  ;;  %v493_v27 = vadd.f32 %v492_v22, %v491_v21 }
 0x11e   :  { %v442_v31 = vadd.f32 %v441_v62, %v440_v26  ;;  %v495_v32 = vadd.f32 %v494_v28, %v493_v27 }
 0x120   :  { %v497_v35 = vadd.f32 %v496_v33, %v495_v32  ;;  %v444_v36 = vadd.f32 %v443_v34, %v442_v31 }
 0x122   :  { %v499_v42 = vadd.f32 %v498_v37, %v497_v35  ;;  %v446_v43 = vadd.f32 %v445_v14, %v444_v36 }
 0x124   :  { %v501_v44 = vadd.f32 %v500_v39, %v499_v42  ;;  %v448_v45 = vadd.f32 %v447_v24, %v446_v43 }
 0x126   :  { %v449_v48 = vrot.slane %v448_v45, 4  ;;  %v503_v49 = vadd.f32 %v502_v47, %v501_v44 }
 0x128   :  { %v450_v41 = vadd.f32 %v449_v48, %v448_v45  ;;  %v504_v50 = vrot.slane %v503_v49, 4 }
 0x12a   :  { %v451_v51 = vrot.slane %v450_v41, 2  ;;  %v505_v52 = vadd.f32 %v504_v50, %v503_v49 }
 0x12c   :  { %v452_v53 = vadd.f32 %v451_v51, %v450_v41  ;;  %v506_v54 = vrot.slane %v505_v52, 2 }
 0x12e   :  { %v453_v55 = vrot.slane %v452_v53, 1  ;;  %v507_v56 = vadd.f32 %v506_v54, %v505_v52 }
 0x130   :  { %v454_v57 = vadd.f32 %v453_v55, %v452_v53  ;;  %v508_v58 = vrot.slane %v507_v56, 1 }
 0x132   :  { %456 = vst.msk [vmem:[%s968_s3] sm:$0x1] %vm455_vm2, %v454_v57  ;;  %v509_v59 = vadd.f32 %v508_v58, %v507_v56 }
 0x134   :  { %510 = vst.msk [vmem:[%s969_s4] sm:$0x1] %vm455_vm2, %v509_v59 }

// kernel: _lambda_.5
= control target key start
LH: loop header
LB: loop body
LE: loop exit
PB: predicated region body
PF: predicated region fallthrough
CT: control target
= control target key end

     0   :  { %vm433_vm0 = vcmask 519168   ;;  %vm438_vm1 = vcmask 523264   ;;  %vm452_vm2 = vcmask 516096   ;;  %s807_s1 = inlined_call_operand.vmem [shape: bf16[512,64], index: 1, kind: input, shape index: {}]   ;;  %s808_s0 = inlined_call_operand.vmem [shape: bf16[32,512], index: 0, kind: input, shape index: {}]   ;;  %s809_s2 = inlined_call_operand.vmem [shape: bf16[32,64], index: 2, kind: output, shape index: {0}]   ;;  %s810_s3 = inlined_call_operand.vmem [shape: f32[1,1,64], index: 3, kind: output, shape index: {1}]   ;;  %s811_s4 = inlined_call_operand.vmem [shape: f32[1,1,64], index: 4, kind: output, shape index: {2}]  }
   0x1   :  { %v588_v0 = vld [vmem:[%s807_s1 + $0x40] sm:$0xff]   ;;  %v592_v4 = vld [vmem:[%s807_s1 + $0x48] sm:$0xff]   ;;  %v596_v8 = vld [vmem:[%s807_s1 + $0x50] sm:$0xff]  }
   0x2   :  { %v589_v1 = vld [vmem:[%s807_s1 + $0xc0] sm:$0xff]   ;;  %532 = vmatprep.subr.bf16.mxu0 %v588_v0  ;;  %v593_v5 = vld [vmem:[%s807_s1 + $0xc8] sm:$0xff]   ;;  %v597_v9 = vld [vmem:[%s807_s1 + $0xd0] sm:$0xff]  }
   0x3   :  { %v590_v2 = vld [vmem:[%s807_s1] sm:$0xff]   ;;  %560 = vmatprep.subr.bf16.mxu1 %v589_v1  ;;  %v594_v6 = vld [vmem:[%s807_s1 + $0x8] sm:$0xff]   ;;  %v598_v10 = vld [vmem:[%s807_s1 + $0x10] sm:$0xff]  }
   0x4   :  { %v591_v3 = vld [vmem:[%s807_s1 + $0x80] sm:$0xff]   ;;  %533 = vmatpush3.bf16.msra.mxu0 %v590_v2  ;;  %v595_v7 = vld [vmem:[%s807_s1 + $0x88] sm:$0xff]   ;;  %v599_v11 = vld [vmem:[%s807_s1 + $0x90] sm:$0xff]  }
   0x5   :  { %561 = vmatpush3.bf16.msra.mxu1 %v591_v3  ;;  %534 = vmatprep.subr.bf16.mxu0 %v592_v4  ;;  %v600_v12 = vld [vmem:[%s807_s1 + $0x58] sm:$0xff]   ;;  %v604_v16 = vld [vmem:[%s807_s1 + $0x60] sm:$0xff]   ;;  %v608_v20 = vld [vmem:[%s807_s1 + $0x68] sm:$0xff]  }
   0x6   :  { %562 = vmatprep.subr.bf16.mxu1 %v593_v5  ;;  %v601_v13 = vld [vmem:[%s807_s1 + $0xd8] sm:$0xff]   ;;  %v605_v17 = vld [vmem:[%s807_s1 + $0xe0] sm:$0xff]   ;;  %v609_v21 = vld [vmem:[%s807_s1 + $0xe8] sm:$0xff]  }
   0x7   :  { %v602_v14 = vld [vmem:[%s807_s1 + $0x18] sm:$0xff]   ;;  %v606_v18 = vld [vmem:[%s807_s1 + $0x20] sm:$0xff]   ;;  %v610_v22 = vld [vmem:[%s807_s1 + $0x28] sm:$0xff]  }
   0x8   :  { %535 = vmatpush3.bf16.msra.mxu0 %v594_v6  ;;  %v603_v15 = vld [vmem:[%s807_s1 + $0x98] sm:$0xff]   ;;  %v607_v19 = vld [vmem:[%s807_s1 + $0xa0] sm:$0xff]   ;;  %v611_v23 = vld [vmem:[%s807_s1 + $0xa8] sm:$0xff]  }
   0x9   :  { %563 = vmatpush3.bf16.msra.mxu1 %v595_v7  ;;  %536 = vmatprep.subr.bf16.mxu0 %v596_v8  ;;  %v612_v24 = vld [vmem:[%s807_s1 + $0x70] sm:$0xff]   ;;  %v616_v28 = vld [vmem:[%s807_s1 + $0x78] sm:$0xff]  }
   0xa   :  { %564 = vmatprep.subr.bf16.mxu1 %v597_v9  ;;  %v613_v25 = vld [vmem:[%s807_s1 + $0xf0] sm:$0xff]   ;;  %v617_v29 = vld [vmem:[%s807_s1 + $0xf8] sm:$0xff]  }
   0xb   :  { %v614_v26 = vld [vmem:[%s807_s1 + $0x30] sm:$0xff]   ;;  %v618_v30 = vld [vmem:[%s807_s1 + $0x38] sm:$0xff]  }
   0xc   :  { %537 = vmatpush3.bf16.msra.mxu0 %v598_v10  ;;  %v615_v27 = vld [vmem:[%s807_s1 + $0xb0] sm:$0xff]   ;;  %v619_v31 = vld [vmem:[%s807_s1 + $0xb8] sm:$0xff]  }
   0xd   :  { %565 = vmatpush3.bf16.msra.mxu1 %v599_v11  ;;  %538 = vmatprep.subr.bf16.mxu0 %v600_v12  ;;  %v620_v32 = vld [vmem:[%s808_s0] ss:$16 sps:$4 sm:$0xff]   ;;  %v622_v33 = vld [vmem:[%s808_s0 + $0x4] ss:$16 sps:$4 sm:$0xff]   ;;  %v623_v34 = vld [vmem:[%s808_s0 + $0x8] ss:$16 sps:$4 sm:$0xff]  }
   0xe   :  { %566 = vmatprep.subr.bf16.mxu1 %v601_v13  ;;  %v625_v35 = vld [vmem:[%s808_s0 + $0xc] ss:$16 sps:$4 sm:$0xff]   ;;  %351 = vmatprep.mubr.bf16.mxu0 %v622_v33  ;;  %v626_v36 = vld [vmem:[%s808_s0 + $0x24] ss:$16 sps:$4 sm:$0xff]   ;;  %v630_v38 = vld [vmem:[%s808_s0 + $0x20] ss:$16 sps:$4 sm:$0xff]  }
   0xf   :  { %400 = vmatprep.mubr.bf16.mxu1 %v625_v35  ;;  %v628_v37 = vld [vmem:[%s808_s0 + $0x2c] ss:$16 sps:$4 sm:$0xff]   ;;  %v631_v39 = vld [vmem:[%s808_s0 + $0x28] ss:$16 sps:$4 sm:$0xff]  }
  0x10   :  { %539 = vmatpush3.bf16.msra.mxu0 %v602_v14 }
  0x11   :  { %567 = vmatpush3.bf16.msra.mxu1 %v603_v15  ;;  %540 = vmatprep.subr.bf16.mxu0 %v604_v16 }
  0x12   :  { %568 = vmatprep.subr.bf16.mxu1 %v605_v17 }
  0x14   :  { %541 = vmatpush3.bf16.msra.mxu0 %v606_v18 }
  0x15   :  { %569 = vmatpush3.bf16.msra.mxu1 %v607_v19  ;;  %542 = vmatprep.subr.bf16.mxu0 %v608_v20 }
  0x16   :  { %570 = vmatprep.subr.bf16.mxu1 %v609_v21 }
  0x18   :  { %543 = vmatpush3.bf16.msra.mxu0 %v610_v22 }
  0x19   :  { %571 = vmatpush3.bf16.msra.mxu1 %v611_v23  ;;  %544 = vmatprep.subr.bf16.mxu0 %v612_v24 }
  0x1a   :  { %572 = vmatprep.subr.bf16.mxu1 %v613_v25 }
  0x1c   :  { %545 = vmatpush3.bf16.msra.mxu0 %v614_v26 }
  0x1d   :  { %573 = vmatpush3.bf16.msra.mxu1 %v615_v27  ;;  %546 = vmatprep.subr.bf16.mxu0 %v616_v28 }
  0x1e   :  { %574 = vmatprep.subr.bf16.mxu1 %v617_v29 }
  0x20   :  { %547 = vmatpush3.bf16.msra.mxu0 %v618_v30 }
  0x21   :  { %575 = vmatpush3.bf16.msra.mxu1 %v619_v31 }
  0x23   :  { %352 = vmatmul.mubr.bf16.vlgmr.msra.gmra.mrb[0].mxu0 %v620_v32 }
  0x24   :  { %401 = vmatmul.mubr.bf16.vlgmr.msra.gmra.mrb[0].mxu1 %v623_v34  ;;  %359 = vmatprep.mubr.bf16.mxu0 %v626_v36 }
  0x25   :  { %408 = vmatprep.mubr.bf16.mxu1 %v628_v37 }
  0x2b   :  { %360 = vmatmul.mubr.bf16.gmra.mrb[4].mxu0 %v630_v38 }
  0x2c   :  { %409 = vmatmul.mubr.bf16.gmra.mrb[4].mxu1 %v631_v39 }
  0xf6   :  { %v548_v40 = vpop.f32.mrb[0].mxu0 }
  0xf7   :  { %v576_v41 = vpop.f32.mrb[0].mxu1  ;;  %v549_v42 = vpop.f32.mrb[1].mxu0 }
  0xf8   :  { %v550_v43 = vadd.f32 %v549_v42, %v548_v40  ;;  %v577_v44 = vpop.f32.mrb[1].mxu1  ;;  %v551_v45 = vpop.f32.mrb[2].mxu0 }
  0xf9   :  { %v578_v46 = vadd.f32 %v577_v44, %v576_v41  ;;  %v579_v47 = vpop.f32.mrb[2].mxu1  ;;  %v552_v48 = vpop.f32.mrb[3].mxu0 }
  0xfa   :  { %v553_v49 = vadd.f32 %v552_v48, %v551_v45  ;;  %v580_v50 = vpop.f32.mrb[3].mxu1 }
  0xfb   :  { %v403_v51 = vadd.f32 %v578_v46, %v550_v43  ;;  %v581_v52 = vadd.f32 %v580_v50, %v579_v47 }
  0xfd   :  { %v528_v53 = vpack.c.bf16 %v403_v51, %v403_v51  ;;  %v454_v54 = vmul.f32 %v403_v51, %v403_v51  ;;  %v406_v55 = vadd.f32 %v581_v52, %v553_v49  ;;  %v439_v57 = vsel %vm438_vm1, %v403_v51, 0.0 }
  0xfe   :  { %v554_v56 = vpop.f32.mrb[4].mxu0 }
  0xff   :  { %434 = vst.msk [vmem:[%s809_s2] sm:$0xf] %vm433_vm0, %v528_v53  ;;  %v529_v58 = vpack.c.bf16 %v406_v55, %v406_v55  ;;  %v440_v59 = vsel %vm438_vm1, %v406_v55, 0.0  ;;  %v455_v60 = vmul.f32 %v406_v55, %v406_v55  ;;  %v582_v61 = vpop.f32.mrb[4].mxu1  ;;  %v555_v62 = vpop.f32.mrb[5].mxu0  ;;  %v458_v3 = vsel %vm438_vm1, %v454_v54, 0.0 }
 0x100   :  { %v441_v63 = vadd.f32 %v440_v59, %v439_v57  ;;  %v556_v0 = vadd.f32 %v555_v62, %v554_v56  ;;  %v583_v1 = vpop.f32.mrb[5].mxu1  ;;  %v557_v2 = vpop.f32.mrb[6].mxu0 }
 0x101   :  { %435 = vst.msk [vmem:[%s809_s2 + $0x4] sm:$0xf] %vm433_vm0, %v529_v58  ;;  %v459_v4 = vsel %vm438_vm1, %v455_v60, 0.0  ;;  %v584_v5 = vadd.f32 %v583_v1, %v582_v61  ;;  %v585_v6 = vpop.f32.mrb[6].mxu1  ;;  %v558_v7 = vpop.f32.mrb[7].mxu0 }
 0x102   :  { %v460_v8 = vadd.f32 %v459_v4, %v458_v3  ;;  %v559_v9 = vadd.f32 %v558_v7, %v557_v2  ;;  %v586_v10 = vpop.f32.mrb[7].mxu1 }
 0x103   :  { %v411_v11 = vadd.f32 %v584_v5, %v556_v0  ;;  %v587_v12 = vadd.f32 %v586_v10, %v585_v6 }
 0x105   :  { %v530_v13 = vpack.c.bf16 %v411_v11, %v411_v11  ;;  %v442_v14 = vsel %vm438_vm1, %v411_v11, 0.0  ;;  %v456_v15 = vmul.f32 %v411_v11, %v411_v11  ;;  %v414_v16 = vadd.f32 %v587_v12, %v559_v9 }
 0x106   :  { %v443_v17 = vadd.f32 %v442_v14, %v441_v63 }
 0x107   :  { %436 = vst.msk [vmem:[%s809_s2 + $0x8] sm:$0xf] %vm433_vm0, %v530_v13  ;;  %v461_v18 = vsel %vm438_vm1, %v456_v15, 0.0  ;;  %v531_v19 = vpack.c.bf16 %v414_v16, %v414_v16  ;;  %v444_v20 = vsel %vm438_vm1, %v414_v16, 0.0  ;;  %v457_v21 = vmul.f32 %v414_v16, %v414_v16 }
 0x108   :  { %v462_v22 = vadd.f32 %v461_v18, %v460_v8  ;;  %v445_v23 = vadd.f32 %v444_v20, %v443_v17 }
 0x109   :  { %437 = vst.msk [vmem:[%s809_s2 + $0xc] sm:$0xf] %vm433_vm0, %v531_v19  ;;  %v463_v24 = vsel %vm438_vm1, %v457_v21, 0.0 }
 0x10a   :  { %v446_v25 = vrot.slane %v445_v23, 4  ;;  %v464_v26 = vadd.f32 %v463_v24, %v462_v22 }
 0x10c   :  { %v447_v27 = vadd.f32 %v446_v25, %v445_v23  ;;  %v465_v28 = vrot.slane %v464_v26, 4 }
 0x10e   :  { %v448_v29 = vrot.slane %v447_v27, 2  ;;  %v466_v30 = vadd.f32 %v465_v28, %v464_v26 }
 0x110   :  { %v449_v31 = vadd.f32 %v448_v29, %v447_v27  ;;  %v467_v32 = vrot.slane %v466_v30, 2 }
 0x112   :  { %v450_v33 = vrot.slane %v449_v31, 1  ;;  %v468_v34 = vadd.f32 %v467_v32, %v466_v30 }
 0x114   :  { %v451_v35 = vadd.f32 %v450_v33, %v449_v31  ;;  %v469_v36 = vrot.slane %v468_v34, 1 }
 0x116   :  { %453 = vst.msk [vmem:[%s810_s3] sm:$0x1] %vm452_vm2, %v451_v35  ;;  %v470_v37 = vadd.f32 %v469_v36, %v468_v34 }
 0x118   :  { %471 = vst.msk [vmem:[%s811_s4] sm:$0x1] %vm452_vm2, %v470_v37 }

</bundles_post_ra>
